<compile_context>
chip_gen: v7x
topology: tpu7x:2x2x1
jax: 0.10.0
libtpu: 0.0.40
codegen_flags: <defaults>
</compile_context>

<pallas_src>
import jax
import jax.numpy as jnp
from jax.experimental import pallas as pl
from jax.experimental.pallas import tpu as pltpu

EPS = 1e-5
_LANES = 128


def _round_up(n, m):
    return ((n + m - 1) // m) * m


# ---------------------------------------------------------------------------
# one-time weight packing (cache the result; do NOT rebuild every forward)
# ---------------------------------------------------------------------------
def pack_tem_decoder_params(params):
    c_out, d_model = params["w_val"].shape
    mark_dim = params["w_tmp"].shape[0]
    d_ff = params["w1"].shape[1]

    Pin = _round_up(c_out + mark_dim, _LANES)   # packed decoder-input channels
    Pd = _round_up(d_model, _LANES)             # model width
    Pf = _round_up(d_ff, _LANES)                # FFN hidden width
    Pc = _round_up(c_out, _LANES)               # output width
    Pv = max(Pd, Pf, Pc)                        # 1xD vector slab width

    bf16 = jnp.bfloat16
    scale = 1.0 / (d_model ** 0.5)

    def pad2(w, rows, cols):
        return jnp.pad(w, ((0, rows - w.shape[0]), (0, cols - w.shape[1])))

    # fused value + temporal embedding: input lanes [0:c_out | c_out:+mark]
    emb_w = jnp.zeros((Pin, Pd), jnp.float32)
    emb_w = emb_w.at[:c_out, :d_model].set(params["w_val"])
    emb_w = emb_w.at[c_out:c_out + mark_dim, :d_model].set(params["w_tmp"])

    # fused self-attention projections: columns [q*scale | k | v]
    qkv_w = jnp.concatenate([pad2(params["wq"] * scale, Pd, Pd),
                             pad2(params["wk"], Pd, Pd),
                             pad2(params["wv"], Pd, Pd)], axis=1)   # (Pd, 3Pd)
    # fused cross-attention key/value projections (applied to enc_out)
    ckv_w = jnp.concatenate([pad2(params["ck"], Pd, Pd),
                             pad2(params["cv"], Pd, Pd)], axis=1)   # (Pd, 2Pd)
    # remaining (Pd, Pd) squares stacked into one slab: [wo, cq*scale, co]
    misc_w = jnp.stack([pad2(params["wo"], Pd, Pd),
                        pad2(params["cq"] * scale, Pd, Pd),
                        pad2(params["co"], Pd, Pd)])                # (3, Pd, Pd)

    ffn1_w = pad2(params["w1"], Pd, Pf)
    ffn2_w = pad2(params["w2"], Pf, Pd)
    wp_w = pad2(params["wp"], Pd, Pc)

    vec_names = ["b_emb", "ln1_g", "ln1_b", "ln2_g", "ln2_b",
                 "b1", "b2", "ln3_g", "ln3_b", "bp"]
    vecs = jnp.zeros((16, Pv), jnp.float32)
    for i, name in enumerate(vec_names):
        v = jnp.reshape(params[name], (-1,))
        vecs = vecs.at[i, :v.shape[0]].set(v)

    packed = {
        "emb_w": emb_w.astype(bf16),
        "qkv_w": qkv_w.astype(bf16),
        "ckv_w": ckv_w.astype(bf16),
        "misc_w": misc_w.astype(bf16),
        "ffn1_w": ffn1_w.astype(bf16),
        "ffn2_w": ffn2_w.astype(bf16),
        "wp_w": wp_w.astype(bf16),
        "vecs": vecs,                      # f32 (layernorm / bias math is f32)
    }
    dims = {"c_out": c_out, "mark_dim": mark_dim, "d_model": d_model,
            "d_ff": d_ff, "Pin": Pin, "Pd": Pd, "Pf": Pf, "Pc": Pc, "Pv": Pv}
    return packed, dims


# ---------------------------------------------------------------------------
# kernel: one decoder block for one batch element per grid step
# ---------------------------------------------------------------------------
def _make_decoder_kernel(d_model, Pd, Pf, Pc):
    inv_d = 1.0 / float(d_model)
    f32 = jnp.float32
    bf16 = jnp.bfloat16

    def kernel(dec_ref, enc_ref, emb_ref, qkv_ref, ckv_ref, misc_ref,
               ffn1_ref, ffn2_ref, wp_ref, vec_ref, out_ref):

        def mm(a, w):
            # (R, Din) @ (Din, Dout) on the MXU; bf16 inputs, f32 accumulation.
            return jax.lax.dot_general(
                a.astype(bf16), w.astype(bf16),
                dimension_numbers=(((1,), (0,)), ((), ())),
                preferred_element_type=f32)

        def mm_nt(a, b):
            # (Lq, D) x (Lk, D) contracting the lane dims -> (Lq, Lk); no
            # explicit transpose materialized.
            return jax.lax.dot_general(
                a.astype(bf16), b.astype(bf16),
                dimension_numbers=(((1,), (1,)), ((), ())),
                preferred_element_type=f32)

        def vrow(i, width):
            return vec_ref[i:i + 1, :width]       # (1, width), broadcasts

        def layernorm(h, g, b):
            # Padded lanes of h are exactly zero -> full-lane sums equal sums
            # over the real d_model lanes; normalize with the real width.
            mu = jnp.sum(h, axis=-1, keepdims=True) * inv_d
            var = jnp.sum(h * h, axis=-1, keepdims=True) * inv_d - mu * mu
            return (h - mu) * jax.lax.rsqrt(var + EPS) * g + b

        def softmax(s):
            s = s - jnp.max(s, axis=-1, keepdims=True)
            p = jnp.exp(s)
            return p * pl.reciprocal(jnp.sum(p, axis=-1, keepdims=True),
                                     approx=True)

        b_emb = vrow(0, Pd)
        ln1_g, ln1_b = vrow(1, Pd), vrow(2, Pd)
        ln2_g, ln2_b = vrow(3, Pd), vrow(4, Pd)
        b1 = vrow(5, Pf)
        b2 = vrow(6, Pd)
        ln3_g, ln3_b = vrow(7, Pd), vrow(8, Pd)
        bp = vrow(9, Pc)

        # fused value + temporal embedding (value|mark channels pre-packed)
        x = mm(dec_ref[...], emb_ref[...]) + b_emb            # (Ld, Pd) f32

        # --- self-attention: one fused qkv matmul, static lane slices ------
        qkv = mm(x, qkv_ref[...])                             # (Ld, 3*Pd)
        q, k, v = qkv[:, :Pd], qkv[:, Pd:2 * Pd], qkv[:, 2 * Pd:]
        p = softmax(mm_nt(q, k))                              # (Ld, Ld)
        sa = mm(mm(p, v), misc_ref[0])                        # @ wo
        x = layernorm(x + sa, ln1_g, ln1_b)

        # --- cross-attention against enc_out: one fused kv matmul ----------
        q = mm(x, misc_ref[1])                                # @ cq (pre-scaled)
        kv = mm(enc_ref[...], ckv_ref[...])                   # (Le, 2*Pd)
        k, v = kv[:, :Pd], kv[:, Pd:]
        p = softmax(mm_nt(q, k))                              # (Ld, Le)
        ca = mm(mm(p, v), misc_ref[2])                        # @ co
        x = layernorm(x + ca, ln2_g, ln2_b)

        # --- position-wise feed-forward -------------------------------------
        h = jnp.maximum(mm(x, ffn1_ref[...]) + b1, 0.0)       # (Ld, Pf)
        x = layernorm(x + mm(h, ffn2_ref[...]) + b2, ln3_g, ln3_b)

        # --- output projection -> decoded energy (lane-dense slab) ----------
        out_ref[...] = mm(x, wp_ref[...]) + bp

    return kernel


# ---------------------------------------------------------------------------
# wrapper: mirror of TEMDecoderInferencer.forward
# ---------------------------------------------------------------------------
def tem_decoder_inferencer_forward(y_hat, batch_x, batch_x_mark, dec_inp,
                                   batch_y_mark, enc_out, packed, dims):
    """batch_x / batch_x_mark feed only the encoder, whose output `enc_out`
    is provided directly.  `packed`, `dims` come from pack_tem_decoder_params
    (computed once at init and reused)."""
    del batch_x, batch_x_mark
    B, Ld, c_out = y_hat.shape
    _, Le, d_model = enc_out.shape
    mark_dim = batch_y_mark.shape[-1]

    Pin, Pd, Pf, Pc = dims["Pin"], dims["Pd"], dims["Pf"], dims["Pc"]
    bf16 = jnp.bfloat16

    # Pack value + mark channels contiguously, then lane-pad once.
    dec_cat = jnp.concatenate([y_hat + dec_inp, batch_y_mark], axis=-1)
    dec_in = jnp.pad(dec_cat, ((0, 0), (0, 0), (0, Pin - (c_out + mark_dim))))
    dec_in = dec_in.astype(bf16).reshape(B * Ld, Pin)
    enc_in = jnp.pad(enc_out, ((0, 0), (0, 0), (0, Pd - d_model)))
    enc_in = enc_in.astype(bf16).reshape(B * Le, Pd)
    # TODO(synk): Ld / Le must stay multiples of 8 for the row-block specs;
    #             pad the sequence axes in the wrapper if they are not.

    kernel = _make_decoder_kernel(d_model, Pd, Pf, Pc)

    def resident(shape):
        # Weight slab: same block every step -> stays VMEM-resident.
        zeros = (0,) * len(shape)

        def index_map(b):
            return zeros

        return pl.BlockSpec(shape, index_map)

    weight_names = ["emb_w", "qkv_w", "ckv_w", "misc_w",
                    "ffn1_w", "ffn2_w", "wp_w", "vecs"]
    weights = [packed[n] for n in weight_names]

    out = pl.pallas_call(
        kernel,
        out_shape=jax.ShapeDtypeStruct((B * Ld, Pc), jnp.float32),
        grid_spec=pltpu.PrefetchScalarGridSpec(
            num_scalar_prefetch=0,
            grid=(B,),   # one batch element per step; parallel -> megacore
            in_specs=[pl.BlockSpec((Ld, Pin), lambda b: (b, 0)),
                      pl.BlockSpec((Le, Pd), lambda b: (b, 0))]
                     + [resident(w.shape) for w in weights],
            out_specs=pl.BlockSpec((Ld, Pc), lambda b: (b, 0)),
        ),
        compiler_params=pltpu.CompilerParams(
            dimension_semantics=("parallel",)),
    )(dec_in, enc_in, *weights)

    # slice the lane-dense output slab back to the real c_out width
    return out.reshape(B, Ld, Pc)[..., :c_out]


# ---------------------------------------------------------------------------
# pure-JAX f32 reference + parameter init + demo
# ---------------------------------------------------------------------------
def _reference(y_hat, dec_inp, y_mark, enc_out, p):
    d_model = p["wq"].shape[0]
    scale = 1.0 / (d_model ** 0.5)

    def ln(h, g, b):
        mu = h.mean(-1, keepdims=True)
        var = ((h - mu) ** 2).mean(-1, keepdims=True)
        return (h - mu) * jax.lax.rsqrt(var + EPS) * g + b

    def attn(q_in, kv_in, wq, wk, wv, wo):
        q = q_in @ wq
        k = kv_in @ wk
        v = kv_in @ wv
        s = jnp.einsum("bld,bmd->blm", q, k) * scale
        s = s - s.max(-1, keepdims=True)
        pr = jnp.exp(s)
        pr = pr / pr.sum(-1, keepdims=True)
        return jnp.einsum("blm,bmd->bld", pr, v) @ wo

    x = (y_hat + dec_inp) @ p["w_val"] + y_mark @ p["w_tmp"] + p["b_emb"]
    x = ln(x + attn(x, x, p["wq"], p["wk"], p["wv"], p["wo"]),
           p["ln1_g"], p["ln1_b"])
    x = ln(x + attn(x, enc_out, p["cq"], p["ck"], p["cv"], p["co"]),
           p["ln2_g"], p["ln2_b"])
    h = jnp.maximum(x @ p["w1"] + p["b1"], 0.0)
    x = ln(x + h @ p["w2"] + p["b2"], p["ln3_g"], p["ln3_b"])
    return x @ p["wp"] + p["bp"]


def _init_params(key, c_out, mark_dim, d_model, d_ff):
    shapes = {
        "w_val": (c_out, d_model), "w_tmp": (mark_dim, d_model), "b_emb": (1, d_model),
        "wq": (d_model, d_model), "wk": (d_model, d_model),
        "wv": (d_model, d_model), "wo": (d_model, d_model),
        "ln1_g": (1, d_model), "ln1_b": (1, d_model),
        "cq": (d_model, d_model), "ck": (d_model, d_model),
        "cv": (d_model, d_model), "co": (d_model, d_model),
        "ln2_g": (1, d_model), "ln2_b": (1, d_model),
        "w1": (d_model, d_ff), "b1": (1, d_ff),
        "w2": (d_ff, d_model), "b2": (1, d_model),
        "ln3_g": (1, d_model), "ln3_b": (1, d_model),
        "wp": (d_model, c_out), "bp": (1, c_out),
    }
    params = {}
    keys = jax.random.split(key, len(shapes))
    for k, (name, shp) in zip(keys, sorted(shapes.items())):
        if name.startswith("ln") and name.endswith("_g"):
            params[name] = 1.0 + 0.1 * jax.random.normal(k, shp, jnp.float32)
        else:
            params[name] = 0.1 * jax.random.normal(k, shp, jnp.float32)
    return params


if __name__ == "__main__":
    B, Ld, Le = 2, 8, 16
    c_out, mark_dim, d_model, d_ff = 4, 4, 32, 64

    root = jax.random.PRNGKey(0)
    k_yhat, k_x, k_xm, k_dec, k_ym, k_enc, k_par = jax.random.split(root, 7)

    y_hat = jax.random.normal(k_yhat, (B, Ld, c_out), jnp.float32)         # nn.Parameter
    batch_x = jax.random.normal(k_x, (B, Le, c_out), jnp.float32)           # encoder side (unused)
    batch_x_mark = jax.random.normal(k_xm, (B, Le, mark_dim), jnp.float32)  # encoder side (unused)
    dec_inp = jax.random.normal(k_dec, (B, Ld, c_out), jnp.float32)
    batch_y_mark = jax.random.normal(k_ym, (B, Ld, mark_dim), jnp.float32)
    enc_out = jax.random.normal(k_enc, (B, Le, d_model), jnp.float32)

    params = _init_params(k_par, c_out, mark_dim, d_model, d_ff)

    # one-time packing (reused across every forward call / inference step)
    packed, dims = pack_tem_decoder_params(params)

    energy = tem_decoder_inferencer_forward(
        y_hat, batch_x, batch_x_mark, dec_inp, batch_y_mark, enc_out,
        packed, dims)
    energy = jax.block_until_ready(energy)

    ref = _reference(y_hat, dec_inp, batch_y_mark, enc_out, params)
    assert energy.shape == (B, Ld, c_out)
    # Kernel uses bf16 MXU inputs (f32 accumulation) and an approx-reciprocal
    # softmax; tolerance vs. the f32 reference is sized for bf16 precision.
    assert jnp.allclose(energy, ref, atol=3e-2, rtol=3e-2), \
        "mismatch vs JAX reference"

    print("KERNEL_OK")
</pallas_src>

<mosaic_0001>
module attributes {stable_mosaic.version = 11 : i64} {
  func.func @kernel(%arg0: i32, %arg1: memref<8x128xbf16, #tpu.memory_space<vmem>>, %arg2: memref<16x128xbf16, #tpu.memory_space<vmem>>, %arg3: memref<128x128xbf16, #tpu.memory_space<vmem>>, %arg4: memref<128x384xbf16, #tpu.memory_space<vmem>>, %arg5: memref<128x256xbf16, #tpu.memory_space<vmem>>, %arg6: memref<3x128x128xbf16, #tpu.memory_space<vmem>>, %arg7: memref<128x128xbf16, #tpu.memory_space<vmem>>, %arg8: memref<128x128xbf16, #tpu.memory_space<vmem>>, %arg9: memref<128x128xbf16, #tpu.memory_space<vmem>>, %arg10: memref<16x128xf32, #tpu.memory_space<vmem>>, %arg11: memref<8x128xf32, #tpu.memory_space<vmem>>) attributes {dimension_semantics = [#tpu.dimension_semantics<parallel>], iteration_bounds = array<i64: 2>, scalar_prefetch = 0 : i64, scratch_operands = 0 : i64, tpu.core_type = #tpu.core_type<tc>, window_params = [{transform_indices = @transform_0, window_bounds = array<i64: 8, 128>}, {transform_indices = @transform_1, window_bounds = array<i64: 16, 128>}, {pipeline_mode = #tpu.pipeline_mode<synchronous>, transform_indices = @transform_2, window_bounds = array<i64: 128, 128>}, {pipeline_mode = #tpu.pipeline_mode<synchronous>, transform_indices = @transform_3, window_bounds = array<i64: 128, 384>}, {pipeline_mode = #tpu.pipeline_mode<synchronous>, transform_indices = @transform_4, window_bounds = array<i64: 128, 256>}, {pipeline_mode = #tpu.pipeline_mode<synchronous>, transform_indices = @transform_5, window_bounds = array<i64: 3, 128, 128>}, {pipeline_mode = #tpu.pipeline_mode<synchronous>, transform_indices = @transform_6, window_bounds = array<i64: 128, 128>}, {pipeline_mode = #tpu.pipeline_mode<synchronous>, transform_indices = @transform_7, window_bounds = array<i64: 128, 128>}, {pipeline_mode = #tpu.pipeline_mode<synchronous>, transform_indices = @transform_8, window_bounds = array<i64: 128, 128>}, {pipeline_mode = #tpu.pipeline_mode<synchronous>, transform_indices = @transform_9, window_bounds = array<i64: 16, 128>}, {transform_indices = @transform_10, window_bounds = array<i64: 8, 128>}]} {
    %c0 = arith.constant 0 : index
    %c0_0 = arith.constant 0 : index
    %0 = vector.load %arg10[%c0, %c0_0] : memref<16x128xf32, #tpu.memory_space<vmem>>, vector<1x128xf32>
    %c1 = arith.constant 1 : index
    %c0_1 = arith.constant 0 : index
    %1 = vector.load %arg10[%c1, %c0_1] : memref<16x128xf32, #tpu.memory_space<vmem>>, vector<1x128xf32>
    %c2 = arith.constant 2 : index
    %c0_2 = arith.constant 0 : index
    %2 = vector.load %arg10[%c2, %c0_2] : memref<16x128xf32, #tpu.memory_space<vmem>>, vector<1x128xf32>
    %c3 = arith.constant 3 : index
    %c0_3 = arith.constant 0 : index
    %3 = vector.load %arg10[%c3, %c0_3] : memref<16x128xf32, #tpu.memory_space<vmem>>, vector<1x128xf32>
    %c4 = arith.constant 4 : index
    %c0_4 = arith.constant 0 : index
    %4 = vector.load %arg10[%c4, %c0_4] : memref<16x128xf32, #tpu.memory_space<vmem>>, vector<1x128xf32>
    %c5 = arith.constant 5 : index
    %c0_5 = arith.constant 0 : index
    %5 = vector.load %arg10[%c5, %c0_5] : memref<16x128xf32, #tpu.memory_space<vmem>>, vector<1x128xf32>
    %c6 = arith.constant 6 : index
    %c0_6 = arith.constant 0 : index
    %6 = vector.load %arg10[%c6, %c0_6] : memref<16x128xf32, #tpu.memory_space<vmem>>, vector<1x128xf32>
    %c7 = arith.constant 7 : index
    %c0_7 = arith.constant 0 : index
    %7 = vector.load %arg10[%c7, %c0_7] : memref<16x128xf32, #tpu.memory_space<vmem>>, vector<1x128xf32>
    %c8 = arith.constant 8 : index
    %c0_8 = arith.constant 0 : index
    %8 = vector.load %arg10[%c8, %c0_8] : memref<16x128xf32, #tpu.memory_space<vmem>>, vector<1x128xf32>
    %c9 = arith.constant 9 : index
    %c0_9 = arith.constant 0 : index
    %9 = vector.load %arg10[%c9, %c0_9] : memref<16x128xf32, #tpu.memory_space<vmem>>, vector<1x128xf32>
    %c0_10 = arith.constant 0 : index
    %c0_11 = arith.constant 0 : index
    %10 = vector.load %arg1[%c0_10, %c0_11] : memref<8x128xbf16, #tpu.memory_space<vmem>>, vector<8x128xbf16>
    %c0_12 = arith.constant 0 : index
    %c0_13 = arith.constant 0 : index
    %11 = vector.load %arg3[%c0_12, %c0_13] : memref<128x128xbf16, #tpu.memory_space<vmem>>, vector<128x128xbf16>
    %cst = arith.constant dense<0.000000e+00> : vector<8x128xf32>
    %12 = tpu.matmul %10, %11, %cst {dimension_numbers = #tpu.dot_dimension_numbers<[1], [0], [0], [1], [0, 0, 1, 1], [], []>} : vector<8x128xbf16>, vector<128x128xbf16>, vector<8x128xf32> -> vector<8x128xf32>
    %13 = vector.broadcast %0 : vector<1x128xf32> to vector<8x128xf32>
    %14 = arith.addf %12, %13 : vector<8x128xf32>
    %c0_14 = arith.constant 0 : index
    %c0_15 = arith.constant 0 : index
    %15 = vector.load %arg4[%c0_14, %c0_15] : memref<128x384xbf16, #tpu.memory_space<vmem>>, vector<128x384xbf16>
    %16 = arith.truncf %14 : vector<8x128xf32> to vector<8x128xbf16>
    %cst_16 = arith.constant dense<0.000000e+00> : vector<8x384xf32>
    %17 = tpu.matmul %16, %15, %cst_16 {dimension_numbers = #tpu.dot_dimension_numbers<[1], [0], [0], [1], [0, 0, 1, 1], [], []>} : vector<8x128xbf16>, vector<128x384xbf16>, vector<8x384xf32> -> vector<8x384xf32>
    %18 = vector.extract_strided_slice %17 {offsets = [0, 0], sizes = [8, 128], strides = [1, 1]} : vector<8x384xf32> to vector<8x128xf32>
    %19 = vector.extract_strided_slice %17 {offsets = [0, 128], sizes = [8, 128], strides = [1, 1]} : vector<8x384xf32> to vector<8x128xf32>
    %20 = vector.extract_strided_slice %17 {offsets = [0, 256], sizes = [8, 128], strides = [1, 1]} : vector<8x384xf32> to vector<8x128xf32>
    %21 = arith.truncf %18 : vector<8x128xf32> to vector<8x128xbf16>
    %22 = arith.truncf %19 : vector<8x128xf32> to vector<8x128xbf16>
    %cst_17 = arith.constant dense<0.000000e+00> : vector<8x8xf32>
    %23 = tpu.matmul %21, %22, %cst_17 {dimension_numbers = #tpu.dot_dimension_numbers<[1], [1], [0], [0], [0, 0, 1, 0], [], []>} : vector<8x128xbf16>, vector<8x128xbf16>, vector<8x8xf32> -> vector<8x8xf32>
    %cst_18 = arith.constant dense<0xFF800000> : vector<8xf32>
    %24 = vector.multi_reduction <maximumf>, %23, %cst_18 [1] : vector<8x8xf32> to vector<8xf32>
    %25 = vector.shape_cast %24 : vector<8xf32> to vector<8x1xf32>
    %26 = vector.broadcast %25 : vector<8x1xf32> to vector<8x8xf32>
    %27 = arith.subf %23, %26 : vector<8x8xf32>
    %28 = math.exp %27 : vector<8x8xf32>
    %cst_19 = arith.constant dense<0.000000e+00> : vector<8xf32>
    %29 = vector.multi_reduction <add>, %28, %cst_19 [1] : vector<8x8xf32> to vector<8xf32>
    %30 = vector.shape_cast %29 : vector<8xf32> to vector<8x1xf32>
    %31 = tpu.reciprocal %30 {approx = true} : vector<8x1xf32> -> vector<8x1xf32>
    %32 = vector.broadcast %31 : vector<8x1xf32> to vector<8x8xf32>
    %33 = arith.mulf %28, %32 : vector<8x8xf32>
    %34 = arith.truncf %33 : vector<8x8xf32> to vector<8x8xbf16>
    %35 = arith.truncf %20 : vector<8x128xf32> to vector<8x128xbf16>
    %cst_20 = arith.constant dense<0.000000e+00> : vector<8x128xf32>
    %36 = tpu.matmul %34, %35, %cst_20 {dimension_numbers = #tpu.dot_dimension_numbers<[1], [0], [0], [1], [0, 0, 1, 1], [], []>} : vector<8x8xbf16>, vector<8x128xbf16>, vector<8x128xf32> -> vector<8x128xf32>
    %c0_21 = arith.constant 0 : index
    %c0_22 = arith.constant 0 : index
    %c0_23 = arith.constant 0 : index
    %37 = vector.load %arg6[%c0_21, %c0_22, %c0_23] : memref<3x128x128xbf16, #tpu.memory_space<vmem>>, vector<1x128x128xbf16>
    %38 = vector.shape_cast %37 : vector<1x128x128xbf16> to vector<128x128xbf16>
    %39 = arith.truncf %36 : vector<8x128xf32> to vector<8x128xbf16>
    %cst_24 = arith.constant dense<0.000000e+00> : vector<8x128xf32>
    %40 = tpu.matmul %39, %38, %cst_24 {dimension_numbers = #tpu.dot_dimension_numbers<[1], [0], [0], [1], [0, 0, 1, 1], [], []>} : vector<8x128xbf16>, vector<128x128xbf16>, vector<8x128xf32> -> vector<8x128xf32>
    %41 = arith.addf %14, %40 : vector<8x128xf32>
    %cst_25 = arith.constant dense<0.000000e+00> : vector<8xf32>
    %42 = vector.multi_reduction <add>, %41, %cst_25 [1] : vector<8x128xf32> to vector<8xf32>
    %43 = vector.shape_cast %42 : vector<8xf32> to vector<8x1xf32>
    %cst_26 = arith.constant 3.125000e-02 : f32
    %44 = vector.broadcast %cst_26 : f32 to vector<8x1xf32>
    %45 = arith.mulf %43, %44 : vector<8x1xf32>
    %46 = arith.mulf %41, %41 : vector<8x128xf32>
    %cst_27 = arith.constant dense<0.000000e+00> : vector<8xf32>
    %47 = vector.multi_reduction <add>, %46, %cst_27 [1] : vector<8x128xf32> to vector<8xf32>
    %48 = vector.shape_cast %47 : vector<8xf32> to vector<8x1xf32>
    %cst_28 = arith.constant 3.125000e-02 : f32
    %49 = vector.broadcast %cst_28 : f32 to vector<8x1xf32>
    %50 = arith.mulf %48, %49 : vector<8x1xf32>
    %51 = arith.mulf %45, %45 : vector<8x1xf32>
    %52 = arith.subf %50, %51 : vector<8x1xf32>
    %53 = vector.broadcast %45 : vector<8x1xf32> to vector<8x128xf32>
    %54 = arith.subf %41, %53 : vector<8x128xf32>
    %cst_29 = arith.constant 9.99999974E-6 : f32
    %55 = vector.broadcast %cst_29 : f32 to vector<8x1xf32>
    %56 = arith.addf %52, %55 : vector<8x1xf32>
    %57 = math.rsqrt %56 : vector<8x1xf32>
    %58 = vector.broadcast %57 : vector<8x1xf32> to vector<8x128xf32>
    %59 = arith.mulf %54, %58 : vector<8x128xf32>
    %60 = vector.broadcast %1 : vector<1x128xf32> to vector<8x128xf32>
    %61 = arith.mulf %59, %60 : vector<8x128xf32>
    %62 = vector.broadcast %2 : vector<1x128xf32> to vector<8x128xf32>
    %63 = arith.addf %61, %62 : vector<8x128xf32>
    %c1_30 = arith.constant 1 : index
    %c0_31 = arith.constant 0 : index
    %c0_32 = arith.constant 0 : index
    %64 = vector.load %arg6[%c1_30, %c0_31, %c0_32] : memref<3x128x128xbf16, #tpu.memory_space<vmem>>, vector<1x128x128xbf16>
    %65 = vector.shape_cast %64 : vector<1x128x128xbf16> to vector<128x128xbf16>
    %66 = arith.truncf %63 : vector<8x128xf32> to vector<8x128xbf16>
    %cst_33 = arith.constant dense<0.000000e+00> : vector<8x128xf32>
    %67 = tpu.matmul %66, %65, %cst_33 {dimension_numbers = #tpu.dot_dimension_numbers<[1], [0], [0], [1], [0, 0, 1, 1], [], []>} : vector<8x128xbf16>, vector<128x128xbf16>, vector<8x128xf32> -> vector<8x128xf32>
    %c0_34 = arith.constant 0 : index
    %c0_35 = arith.constant 0 : index
    %68 = vector.load %arg2[%c0_34, %c0_35] : memref<16x128xbf16, #tpu.memory_space<vmem>>, vector<16x128xbf16>
    %c0_36 = arith.constant 0 : index
    %c0_37 = arith.constant 0 : index
    %69 = vector.load %arg5[%c0_36, %c0_37] : memref<128x256xbf16, #tpu.memory_space<vmem>>, vector<128x256xbf16>
    %cst_38 = arith.constant dense<0.000000e+00> : vector<16x256xf32>
    %70 = tpu.matmul %68, %69, %cst_38 {dimension_numbers = #tpu.dot_dimension_numbers<[1], [0], [0], [1], [0, 0, 1, 1], [], []>} : vector<16x128xbf16>, vector<128x256xbf16>, vector<16x256xf32> -> vector<16x256xf32>
    %71 = vector.extract_strided_slice %70 {offsets = [0, 0], sizes = [16, 128], strides = [1, 1]} : vector<16x256xf32> to vector<16x128xf32>
    %72 = vector.extract_strided_slice %70 {offsets = [0, 128], sizes = [16, 128], strides = [1, 1]} : vector<16x256xf32> to vector<16x128xf32>
    %73 = arith.truncf %67 : vector<8x128xf32> to vector<8x128xbf16>
    %74 = arith.truncf %71 : vector<16x128xf32> to vector<16x128xbf16>
    %cst_39 = arith.constant dense<0.000000e+00> : vector<8x16xf32>
    %75 = tpu.matmul %73, %74, %cst_39 {dimension_numbers = #tpu.dot_dimension_numbers<[1], [1], [0], [0], [0, 0, 1, 0], [], []>} : vector<8x128xbf16>, vector<16x128xbf16>, vector<8x16xf32> -> vector<8x16xf32>
    %cst_40 = arith.constant dense<0xFF800000> : vector<8xf32>
    %76 = vector.multi_reduction <maximumf>, %75, %cst_40 [1] : vector<8x16xf32> to vector<8xf32>
    %77 = vector.shape_cast %76 : vector<8xf32> to vector<8x1xf32>
    %78 = vector.broadcast %77 : vector<8x1xf32> to vector<8x16xf32>
    %79 = arith.subf %75, %78 : vector<8x16xf32>
    %80 = math.exp %79 : vector<8x16xf32>
    %cst_41 = arith.constant dense<0.000000e+00> : vector<8xf32>
    %81 = vector.multi_reduction <add>, %80, %cst_41 [1] : vector<8x16xf32> to vector<8xf32>
    %82 = vector.shape_cast %81 : vector<8xf32> to vector<8x1xf32>
    %83 = tpu.reciprocal %82 {approx = true} : vector<8x1xf32> -> vector<8x1xf32>
    %84 = vector.broadcast %83 : vector<8x1xf32> to vector<8x16xf32>
    %85 = arith.mulf %80, %84 : vector<8x16xf32>
    %86 = arith.truncf %85 : vector<8x16xf32> to vector<8x16xbf16>
    %87 = arith.truncf %72 : vector<16x128xf32> to vector<16x128xbf16>
    %cst_42 = arith.constant dense<0.000000e+00> : vector<8x128xf32>
    %88 = tpu.matmul %86, %87, %cst_42 {dimension_numbers = #tpu.dot_dimension_numbers<[1], [0], [0], [1], [0, 0, 1, 1], [], []>} : vector<8x16xbf16>, vector<16x128xbf16>, vector<8x128xf32> -> vector<8x128xf32>
    %c2_43 = arith.constant 2 : index
    %c0_44 = arith.constant 0 : index
    %c0_45 = arith.constant 0 : index
    %89 = vector.load %arg6[%c2_43, %c0_44, %c0_45] : memref<3x128x128xbf16, #tpu.memory_space<vmem>>, vector<1x128x128xbf16>
    %90 = vector.shape_cast %89 : vector<1x128x128xbf16> to vector<128x128xbf16>
    %91 = arith.truncf %88 : vector<8x128xf32> to vector<8x128xbf16>
    %cst_46 = arith.constant dense<0.000000e+00> : vector<8x128xf32>
    %92 = tpu.matmul %91, %90, %cst_46 {dimension_numbers = #tpu.dot_dimension_numbers<[1], [0], [0], [1], [0, 0, 1, 1], [], []>} : vector<8x128xbf16>, vector<128x128xbf16>, vector<8x128xf32> -> vector<8x128xf32>
    %93 = arith.addf %63, %92 : vector<8x128xf32>
    %cst_47 = arith.constant dense<0.000000e+00> : vector<8xf32>
    %94 = vector.multi_reduction <add>, %93, %cst_47 [1] : vector<8x128xf32> to vector<8xf32>
    %95 = vector.shape_cast %94 : vector<8xf32> to vector<8x1xf32>
    %cst_48 = arith.constant 3.125000e-02 : f32
    %96 = vector.broadcast %cst_48 : f32 to vector<8x1xf32>
    %97 = arith.mulf %95, %96 : vector<8x1xf32>
    %98 = arith.mulf %93, %93 : vector<8x128xf32>
    %cst_49 = arith.constant dense<0.000000e+00> : vector<8xf32>
    %99 = vector.multi_reduction <add>, %98, %cst_49 [1] : vector<8x128xf32> to vector<8xf32>
    %100 = vector.shape_cast %99 : vector<8xf32> to vector<8x1xf32>
    %cst_50 = arith.constant 3.125000e-02 : f32
    %101 = vector.broadcast %cst_50 : f32 to vector<8x1xf32>
    %102 = arith.mulf %100, %101 : vector<8x1xf32>
    %103 = arith.mulf %97, %97 : vector<8x1xf32>
    %104 = arith.subf %102, %103 : vector<8x1xf32>
    %105 = vector.broadcast %97 : vector<8x1xf32> to vector<8x128xf32>
    %106 = arith.subf %93, %105 : vector<8x128xf32>
    %cst_51 = arith.constant 9.99999974E-6 : f32
    %107 = vector.broadcast %cst_51 : f32 to vector<8x1xf32>
    %108 = arith.addf %104, %107 : vector<8x1xf32>
    %109 = math.rsqrt %108 : vector<8x1xf32>
    %110 = vector.broadcast %109 : vector<8x1xf32> to vector<8x128xf32>
    %111 = arith.mulf %106, %110 : vector<8x128xf32>
    %112 = vector.broadcast %3 : vector<1x128xf32> to vector<8x128xf32>
    %113 = arith.mulf %111, %112 : vector<8x128xf32>
    %114 = vector.broadcast %4 : vector<1x128xf32> to vector<8x128xf32>
    %115 = arith.addf %113, %114 : vector<8x128xf32>
    %c0_52 = arith.constant 0 : index
    %c0_53 = arith.constant 0 : index
    %116 = vector.load %arg7[%c0_52, %c0_53] : memref<128x128xbf16, #tpu.memory_space<vmem>>, vector<128x128xbf16>
    %117 = arith.truncf %115 : vector<8x128xf32> to vector<8x128xbf16>
    %cst_54 = arith.constant dense<0.000000e+00> : vector<8x128xf32>
    %118 = tpu.matmul %117, %116, %cst_54 {dimension_numbers = #tpu.dot_dimension_numbers<[1], [0], [0], [1], [0, 0, 1, 1], [], []>} : vector<8x128xbf16>, vector<128x128xbf16>, vector<8x128xf32> -> vector<8x128xf32>
    %119 = vector.broadcast %5 : vector<1x128xf32> to vector<8x128xf32>
    %120 = arith.addf %118, %119 : vector<8x128xf32>
    %cst_55 = arith.constant 0.000000e+00 : f32
    %121 = vector.broadcast %cst_55 : f32 to vector<8x128xf32>
    %122 = arith.maximumf %120, %121 : vector<8x128xf32>
    %c0_56 = arith.constant 0 : index
    %c0_57 = arith.constant 0 : index
    %123 = vector.load %arg8[%c0_56, %c0_57] : memref<128x128xbf16, #tpu.memory_space<vmem>>, vector<128x128xbf16>
    %124 = arith.truncf %122 : vector<8x128xf32> to vector<8x128xbf16>
    %cst_58 = arith.constant dense<0.000000e+00> : vector<8x128xf32>
    %125 = tpu.matmul %124, %123, %cst_58 {dimension_numbers = #tpu.dot_dimension_numbers<[1], [0], [0], [1], [0, 0, 1, 1], [], []>} : vector<8x128xbf16>, vector<128x128xbf16>, vector<8x128xf32> -> vector<8x128xf32>
    %126 = arith.addf %115, %125 : vector<8x128xf32>
    %127 = vector.broadcast %6 : vector<1x128xf32> to vector<8x128xf32>
    %128 = arith.addf %126, %127 : vector<8x128xf32>
    %cst_59 = arith.constant dense<0.000000e+00> : vector<8xf32>
    %129 = vector.multi_reduction <add>, %128, %cst_59 [1] : vector<8x128xf32> to vector<8xf32>
    %130 = vector.shape_cast %129 : vector<8xf32> to vector<8x1xf32>
    %cst_60 = arith.constant 3.125000e-02 : f32
    %131 = vector.broadcast %cst_60 : f32 to vector<8x1xf32>
    %132 = arith.mulf %130, %131 : vector<8x1xf32>
    %133 = arith.mulf %128, %128 : vector<8x128xf32>
    %cst_61 = arith.constant dense<0.000000e+00> : vector<8xf32>
    %134 = vector.multi_reduction <add>, %133, %cst_61 [1] : vector<8x128xf32> to vector<8xf32>
    %135 = vector.shape_cast %134 : vector<8xf32> to vector<8x1xf32>
    %cst_62 = arith.constant 3.125000e-02 : f32
    %136 = vector.broadcast %cst_62 : f32 to vector<8x1xf32>
    %137 = arith.mulf %135, %136 : vector<8x1xf32>
    %138 = arith.mulf %132, %132 : vector<8x1xf32>
    %139 = arith.subf %137, %138 : vector<8x1xf32>
    %140 = vector.broadcast %132 : vector<8x1xf32> to vector<8x128xf32>
    %141 = arith.subf %128, %140 : vector<8x128xf32>
    %cst_63 = arith.constant 9.99999974E-6 : f32
    %142 = vector.broadcast %cst_63 : f32 to vector<8x1xf32>
    %143 = arith.addf %139, %142 : vector<8x1xf32>
    %144 = math.rsqrt %143 : vector<8x1xf32>
    %145 = vector.broadcast %144 : vector<8x1xf32> to vector<8x128xf32>
    %146 = arith.mulf %141, %145 : vector<8x128xf32>
    %147 = vector.broadcast %7 : vector<1x128xf32> to vector<8x128xf32>
    %148 = arith.mulf %146, %147 : vector<8x128xf32>
    %149 = vector.broadcast %8 : vector<1x128xf32> to vector<8x128xf32>
    %150 = arith.addf %148, %149 : vector<8x128xf32>
    %c0_64 = arith.constant 0 : index
    %c0_65 = arith.constant 0 : index
    %151 = vector.load %arg9[%c0_64, %c0_65] : memref<128x128xbf16, #tpu.memory_space<vmem>>, vector<128x128xbf16>
    %152 = arith.truncf %150 : vector<8x128xf32> to vector<8x128xbf16>
    %cst_66 = arith.constant dense<0.000000e+00> : vector<8x128xf32>
    %153 = tpu.matmul %152, %151, %cst_66 {dimension_numbers = #tpu.dot_dimension_numbers<[1], [0], [0], [1], [0, 0, 1, 1], [], []>} : vector<8x128xbf16>, vector<128x128xbf16>, vector<8x128xf32> -> vector<8x128xf32>
    %154 = vector.broadcast %9 : vector<1x128xf32> to vector<8x128xf32>
    %155 = arith.addf %153, %154 : vector<8x128xf32>
    %c0_67 = arith.constant 0 : index
    %c0_68 = arith.constant 0 : index
    %156 = vector.load %arg11[%c0_67, %c0_68] : memref<8x128xf32, #tpu.memory_space<vmem>>, vector<8x128xf32>
    tpu.vector_store %arg11[%c0_67, %c0_68], %155 {strides = array<i32>} : memref<8x128xf32, #tpu.memory_space<vmem>>, vector<8x128xf32>,
    return
  }
  func.func @transform_0(%arg0: i32) -> (i32, i32) {
    %c0_i32 = arith.constant 0 : i32
    %c0_i32_0 = arith.constant 0 : i32
    return %arg0, %c0_i32 : i32, i32
  }
  func.func @transform_1(%arg0: i32) -> (i32, i32) {
    %c0_i32 = arith.constant 0 : i32
    %c0_i32_0 = arith.constant 0 : i32
    return %arg0, %c0_i32 : i32, i32
  }
  func.func @transform_2(%arg0: i32) -> (i32, i32) {
    %c0_i32 = arith.constant 0 : i32
    %c0_i32_0 = arith.constant 0 : i32
    %c0_i32_1 = arith.constant 0 : i32
    return %c0_i32, %c0_i32_0 : i32, i32
  }
  func.func @transform_3(%arg0: i32) -> (i32, i32) {
    %c0_i32 = arith.constant 0 : i32
    %c0_i32_0 = arith.constant 0 : i32
    %c0_i32_1 = arith.constant 0 : i32
    return %c0_i32, %c0_i32_0 : i32, i32
  }
  func.func @transform_4(%arg0: i32) -> (i32, i32) {
    %c0_i32 = arith.constant 0 : i32
    %c0_i32_0 = arith.constant 0 : i32
    %c0_i32_1 = arith.constant 0 : i32
    return %c0_i32, %c0_i32_0 : i32, i32
  }
  func.func @transform_5(%arg0: i32) -> (i32, i32, i32) {
    %c0_i32 = arith.constant 0 : i32
    %c0_i32_0 = arith.constant 0 : i32
    %c0_i32_1 = arith.constant 0 : i32
    %c0_i32_2 = arith.constant 0 : i32
    return %c0_i32, %c0_i32_0, %c0_i32_1 : i32, i32, i32
  }
  func.func @transform_6(%arg0: i32) -> (i32, i32) {
    %c0_i32 = arith.constant 0 : i32
    %c0_i32_0 = arith.constant 0 : i32
    %c0_i32_1 = arith.constant 0 : i32
    return %c0_i32, %c0_i32_0 : i32, i32
  }
  func.func @transform_7(%arg0: i32) -> (i32, i32) {
    %c0_i32 = arith.constant 0 : i32
    %c0_i32_0 = arith.constant 0 : i32
    %c0_i32_1 = arith.constant 0 : i32
    return %c0_i32, %c0_i32_0 : i32, i32
  }
  func.func @transform_8(%arg0: i32) -> (i32, i32) {
    %c0_i32 = arith.constant 0 : i32
    %c0_i32_0 = arith.constant 0 : i32
    %c0_i32_1 = arith.constant 0 : i32
    return %c0_i32, %c0_i32_0 : i32, i32
  }
  func.func @transform_9(%arg0: i32) -> (i32, i32) {
    %c0_i32 = arith.constant 0 : i32
    %c0_i32_0 = arith.constant 0 : i32
    %c0_i32_1 = arith.constant 0 : i32
    return %c0_i32, %c0_i32_0 : i32, i32
  }
  func.func @transform_10(%arg0: i32) -> (i32, i32) {
    %c0_i32 = arith.constant 0 : i32
    %c0_i32_0 = arith.constant 0 : i32
    return %arg0, %c0_i32 : i32, i32
  }
}

</mosaic_0001>

<bundles_post_ra>
// kernel: tpu_custom_call.1
= control target key start
LH: loop header
LB: loop body
LE: loop exit
PB: predicated region body
PF: predicated region fallthrough
CT: control target
= control target key end

     0   :  { %s3748_s0 = inlined_call_operand.hbm [shape: bf16[16,128], index: 0, kind: input, shape index: {}]   ;;  %s3749_s1 = inlined_call_operand.hbm [shape: bf16[32,128], index: 1, kind: input, shape index: {}]   ;;  %s3750_s2 = inlined_call_operand.hbm [shape: bf16[128,128], index: 2, kind: input, shape index: {}]   ;;  %s3751_s3 = inlined_call_operand.hbm [shape: bf16[128,384], index: 3, kind: input, shape index: {}]   ;;  %s3752_s4 = inlined_call_operand.hbm [shape: bf16[128,256], index: 4, kind: input, shape index: {}]   ;;  %s3753_s5 = inlined_call_operand.hbm [shape: bf16[3,128,128], index: 5, kind: input, shape index: {}]   ;;  %s3754_s6 = inlined_call_operand.hbm [shape: bf16[128,128], index: 6, kind: input, shape index: {}]   ;;  %s3755_s7 = inlined_call_operand.hbm [shape: bf16[128,128], index: 7, kind: input, shape index: {}]   ;;  %s3756_s8 = inlined_call_operand.hbm [shape: bf16[128,128], index: 8, kind: input, shape index: {}]   ;;  %s3757_s9 = inlined_call_operand.vmem [shape: f32[16,128], index: 9, kind: input, shape index: {}]   ;;  %s3758_s10 = inlined_call_operand.hbm [shape: f32[16,128], index: 10, kind: output, shape index: {}]  }
   0x1   :  { %3768 = sst [smem:[#allocation25_spill]] %s3748_s0 }
   0x2   :  { %3769 = sst [smem:[#allocation26_spill]] %s3750_s2 }
   0x3   :  { %3770 = sst [smem:[#allocation27_spill]] %s3751_s3 }
   0x4   :  { %3771 = sst [smem:[#allocation28_spill]] %s3752_s4 }
   0x5   :  { %3772 = sst [smem:[#allocation29_spill]] %s3753_s5 }
   0x6   :  { %3773 = sst [smem:[#allocation30_spill]] %s3754_s6 }
   0x7   :  { %3774 = sst [smem:[#allocation31_spill]] %s3757_s9 }
   0x8   :  { %3775 = sst [smem:[#allocation32_spill]] %s3758_s10 }
   0x9   :  { %15 = vsyncpa [#allocation3], 0 }
   0xa   :  { %17 = vsyncpa [#allocation3 + $0x1], 0 }
   0xb   :  { %18 = vsyncpa [#allocation6], 0 }
   0xc   :  { %20 = vsyncpa [#allocation6 + $0x1], 0 }
   0xd   :  { %21 = vsyncpa [#allocation9], 0 }
   0xe   :  { %22 = vsyncpa [#allocation12], 0 }
   0xf   :  { %23 = vsyncpa [#allocation15], 0 }
  0x10   :  { %24 = vsyncpa [#allocation4], 0 }
  0x11   :  { %26 = vsyncpa [#allocation4 + $0x1], 0  ;;  %s3200_s13 = smov 0   ;;  %s3202_s14 = smov 0  }
  0x12   :  { %s3204_s15 = smov 0   ;;  %s3206_s16 = smov 0  }
  0x13 LB: > { %s3126_s17 = smov [#allocation7]   ;;  %s3221_s19 = sadd.s32 4294967295, %s3124_s16   ;;  %s3124_s16 = sphi %s3206_s16, %s3810_s16   ;;  %s3120_s15 = sphi %s3204_s15, %s3809_s15   ;;  %s3116_s14 = sphi %s3202_s14, %s3808_s14   ;;  %s3112_s13 = sphi %s3200_s13, %s3807_s13  }
  0x14   : > { %s295_s18 = sshll.u32 %s3126_s17, 4  ;;  %p2121_p0 = scmp.ge.s32.totalorder %s3124_s16, 1  ;;  %s3226_s18 = int_to_ptr.vmem [resolvable:$true] %s295_s18 }
  0x15   : > { %p3763_p1 = scmp.eq.s32.totalorder %s3221_s19, 0  ;;  %p283_p2 = scmp.lt.s32.totalorder %s3124_s16, 3 }
  0x16   : > { %s3127_s21 = smov [#allocation8]   ;;  %s3128_s24 = smov [#allocation11]  }
  0x17   : > { %p3228_p3 = pnand %p2121_p0, %p283_p2  ;;  %s308_s22 = sshll.u32 %s3127_s21, 4  ;;  %s3241_s22 = int_to_ptr.vmem [resolvable:$true] %s308_s22 }
  0x18   : > { %s3243_s25 = sshll.u32 %s3128_s24, 4  ;;  %s3778_s2 = sld [smem:[#allocation26_spill]]  ;;  %s335_s25 = int_to_ptr.vmem [resolvable:$true] %s3243_s25 }
  0x19   : > { %s3776_s20 = scalar_select %p3228_p3, 1, 0 }
  0x1a   : > { %p2558_p5 = pneg %p3228_p3 }
  0x1c   : > { %p3237_p6 = pnand %p2558_p5, %p3763_p1 }
  0x1e   : > { %s2782_s28 = scalar_lea.hbm %s3778_s2, 1024  ;;  %p3253_p8 = pneg %p3237_p6 }
  0x1f   : > { %p2783_p7 = scmp.ne.s32.totalorder %s3778_s2, %s2782_s28  ;;  %p2789_p11 = scmp.lt.u32.totalorder %s2782_s28, %s3778_s2 }
  0x21   : > { %p2785_p9 = pnand %p3253_p8, %p2783_p7 }
  0x23   : > { %p2786_p10 = pneg %p2785_p9 }
  0x25   : > { %p2791_p12 = pnand %p2789_p11, %p2786_p10 }
  0x27   : > { %2794 = shalt.err (!%p2791_p12)
}
  0x28   : > { %s2795_s21 = scalar_lea.vmem %s3226_s18, 1024  ;;  %p2803_p5 = scmp.lt.s32.totalorder %s3226_s18, %s3226_s18 }
  0x29   : > { %p2796_p13 = scmp.ne.s32.totalorder %s3226_s18, %s2795_s21  ;;  %p2804_p4 = scmp.lt.s32.totalorder %s2795_s21, %s2795_s21 }
  0x2b   : > { %p2798_p0 = pnand %p2796_p13, %p3253_p8  ;;  %p2805_p7 = por %p2804_p4, %p2803_p5 }
  0x2d   : > { %p2799_p2 = pneg %p2798_p0 }
  0x2f   : > { %p2806_p9 = pnand %p2805_p7, %p2799_p2 }
  0x31   : > { %2809 = shalt.err (!%p2806_p9)
}
  0x32   : > { %s3761_s24 = smov 64   ;;  %s3765_s26 = smov 4  }
  0x33   : > { %2561 = dma.hbm_to_vmem [thread:$0]  (!%p3237_p6), %s3778_s2, 1024, %s3226_s18, [#allocation6], %s3761_s24, %s3761_s24, %s3765_s26  }
  0x34   : > { %s3780_s3 = sld [smem:[#allocation27_spill]] }
  0x3a   : > { %s2810_s12 = scalar_lea.hbm %s3780_s3, 3072 }
  0x3b   : > { %p2811_p4 = scmp.ne.s32.totalorder %s3780_s3, %s2810_s12  ;;  %p2817_p12 = scmp.lt.u32.totalorder %s2810_s12, %s3780_s3 }
  0x3d   : > { %p2813_p10 = pnand %p2811_p4, %p3253_p8 }
  0x3f   : > { %p2814_p11 = pneg %p2813_p10 }
  0x41   : > { %p2819_p13 = pnand %p2817_p12, %p2814_p11 }
  0x43   : > { %2822 = shalt.err (!%p2819_p13)
}
  0x44   : > { %s2823_s18 = scalar_lea.vmem %s3241_s22, 3072  ;;  %p2831_p7 = scmp.lt.s32.totalorder %s3241_s22, %s3241_s22 }
  0x45   : > { %p2824_p0 = scmp.ne.s32.totalorder %s3241_s22, %s2823_s18  ;;  %p2832_p9 = scmp.lt.s32.totalorder %s2823_s18, %s2823_s18 }
  0x47   : > { %p2826_p2 = pnand %p2824_p0, %p3253_p8  ;;  %p2833_p4 = por %p2832_p9, %p2831_p7 }
  0x49   : > { %p2827_p5 = pneg %p2826_p2 }
  0x4b   : > { %p2834_p10 = pnand %p2833_p4, %p2827_p5 }
  0x4d   : > { %2837 = shalt.err (!%p2834_p10)
}
  0x4e   : > { %s3131_s27 = smov 192   ;;  %s3132_s9 = smov 12  }
  0x4f   : > { %2564 = dma.hbm_to_vmem [thread:$0]  (!%p3237_p6), %s3780_s3, 3072, %s3241_s22, [#allocation9], %s3131_s27, %s3131_s27, %s3132_s9  }
  0x50   : > { %s3781_s5 = sld [smem:[#allocation29_spill]] }
  0x56   : > { %s2838_s12 = scalar_lea.hbm %s3781_s5, 3072 }
  0x57   : > { %p2839_p11 = scmp.ne.s32.totalorder %s3781_s5, %s2838_s12  ;;  %p2845_p0 = scmp.lt.u32.totalorder %s2838_s12, %s3781_s5 }
  0x59   : > { %p2841_p12 = pnand %p2839_p11, %p3253_p8 }
  0x5b   : > { %p2842_p13 = pneg %p2841_p12 }
  0x5d   : > { %p2847_p2 = pnand %p2845_p0, %p2842_p13 }
  0x5f   : > { %2850 = shalt.err (!%p2847_p2)
}
  0x60   : > { %s2851_s10 = scalar_lea.vmem %s335_s25, 3072  ;;  %p2859_p4 = scmp.lt.s32.totalorder %s335_s25, %s335_s25 }
  0x61   : > { %p2852_p5 = scmp.ne.s32.totalorder %s335_s25, %s2851_s10  ;;  %p2860_p10 = scmp.lt.s32.totalorder %s2851_s10, %s2851_s10 }
  0x63   : > { %p2854_p7 = pnand %p2852_p5, %p3253_p8  ;;  %p2861_p1 = por %p2860_p10, %p2859_p4 }
  0x65   : > { %p2855_p9 = pneg %p2854_p7 }
  0x67   : > { %p2862_p3 = pnand %p2861_p1, %p2855_p9 }
  0x69   : > { %2865 = shalt.err (!%p2862_p3)
}
  0x6a   : > { %s3782_s22 = smov 64   ;;  %s3133_s9 = smov [#allocation14]  }
  0x6b   : > { %2570 = dma.hbm_to_vmem [thread:$0]  (!%p3237_p6), %s3781_s5, 3072, %s335_s25, [#allocation12], %s3782_s22, %s3782_s22, %s3765_s26  }
  0x6c   : > { %s360_s28 = sshll.u32 %s3133_s9, 4  ;;  %s3134_s29 = smov [#allocation10]   ;;  %s361_s28 = int_to_ptr.vmem [resolvable:$true] %s360_s28 }
  0x6d   : > { %s321_s30 = sshll.u32 %s3134_s29, 4  ;;  %s2866_s21 = scalar_lea.hbm %s3755_s7, 1024  ;;  %s322_s30 = int_to_ptr.vmem [resolvable:$true] %s321_s30 }
  0x6e   : > { %p2867_p1 = scmp.ne.s32.totalorder %s3755_s7, %s2866_s21  ;;  %p2873_p12 = scmp.lt.u32.totalorder %s2866_s21, %s3755_s7 }
  0x70   : > { %p2869_p3 = pnand %p2867_p1, %p3253_p8 }
  0x72   : > { %p2870_p11 = pneg %p2869_p3 }
  0x74   : > { %p2875_p13 = pnand %p2873_p12, %p2870_p11 }
  0x76   : > { %2878 = shalt.err (!%p2875_p13)
}
  0x77   : > { %s2879_s25 = scalar_lea.vmem %s361_s28, 1024  ;;  %p2887_p7 = scmp.lt.s32.totalorder %s361_s28, %s361_s28 }
  0x78   : > { %p2880_p0 = scmp.ne.s32.totalorder %s361_s28, %s2879_s25  ;;  %p2888_p9 = scmp.lt.s32.totalorder %s2879_s25, %s2879_s25 }
  0x7a   : > { %p2882_p2 = pnand %p2880_p0, %p3253_p8  ;;  %p2889_p4 = por %p2888_p9, %p2887_p7 }
  0x7c   : > { %p2883_p5 = pneg %p2882_p2 }
  0x7e   : > { %p2890_p10 = pnand %p2889_p4, %p2883_p5 }
  0x80   : > { %2893 = shalt.err (!%p2890_p10)
}
  0x81   : > { %2576 = dma.hbm_to_vmem [thread:$0]  (!%p3237_p6), %s3755_s7, 1024, %s361_s28, [#allocation15], %s3782_s22, %s3782_s22, %s3765_s26  }
  0x82   : > { %s3783_s4 = sld [smem:[#allocation28_spill]] }
  0x88   : > { %s2894_s12 = scalar_lea.hbm %s3783_s4, 2048 }
  0x89   : > { %p2895_p1 = scmp.ne.s32.totalorder %s3783_s4, %s2894_s12  ;;  %p2901_p12 = scmp.lt.u32.totalorder %s2894_s12, %s3783_s4 }
  0x8b   : > { %p2897_p3 = pnand %p2895_p1, %p3253_p8 }
  0x8d   : > { %p2898_p11 = pneg %p2897_p3 }
  0x8f   : > { %p2903_p13 = pnand %p2901_p12, %p2898_p11 }
  0x91   : > { %2906 = shalt.err (!%p2903_p13)
}
  0x92   : > { %s2907_s24 = scalar_lea.vmem %s322_s30, 2048  ;;  %p2915_p7 = scmp.lt.s32.totalorder %s322_s30, %s322_s30 }
  0x93   : > { %p2908_p0 = scmp.ne.s32.totalorder %s322_s30, %s2907_s24  ;;  %p2916_p9 = scmp.lt.s32.totalorder %s2907_s24, %s2907_s24 }
  0x95   : > { %p2910_p2 = pnand %p2908_p0, %p3253_p8  ;;  %p2917_p4 = por %p2916_p9, %p2915_p7 }
  0x97   : > { %p2911_p5 = pneg %p2910_p2 }
  0x99   : > { %p2918_p10 = pnand %p2917_p4, %p2911_p5 }
  0x9b   : > { %2921 = shalt.err (!%p2918_p10)
}
  0x9c   : > { %s3135_s28 = smov 128   ;;  %s3136_s25 = smov 8  }
  0x9d   : > { %2567 = dma.hbm_to_vmem [thread:$0]  (!%p3237_p6), %s3783_s4, 2048, %s322_s30, [#allocation9], %s3135_s28, %s3135_s28, %s3136_s25  }
  0x9e   : > { %s3137_s9 = smov [#allocation13]   ;;  %s3138_s12 = smov [#allocation16]  }
  0x9f   : > { %s347_s29 = sshll.u32 %s3137_s9, 4  ;;  %s373_s17 = sshll.u32 %s3138_s12, 4  ;;  %s348_s29 = int_to_ptr.vmem [resolvable:$true] %s347_s29  ;;  %s374_s17 = int_to_ptr.vmem [resolvable:$true] %s373_s17 }
  0xa0   : > { %s3784_s6 = sld [smem:[#allocation30_spill]] }
  0xa6   : > { %s2922_s10 = scalar_lea.hbm %s3784_s6, 1024 }
  0xa7   : > { %p2923_p1 = scmp.ne.s32.totalorder %s3784_s6, %s2922_s10  ;;  %p2929_p12 = scmp.lt.u32.totalorder %s2922_s10, %s3784_s6 }
  0xa9   : > { %p2925_p3 = pnand %p2923_p1, %p3253_p8 }
  0xab   : > { %p2926_p11 = pneg %p2925_p3 }
  0xad   : > { %p2931_p13 = pnand %p2929_p12, %p2926_p11 }
  0xaf   : > { %2934 = shalt.err (!%p2931_p13)
}
  0xb0   : > { %s2935_s30 = scalar_lea.vmem %s348_s29, 1024  ;;  %p2943_p7 = scmp.lt.s32.totalorder %s348_s29, %s348_s29 }
  0xb1   : > { %p2936_p0 = scmp.ne.s32.totalorder %s348_s29, %s2935_s30  ;;  %p2944_p9 = scmp.lt.s32.totalorder %s2935_s30, %s2935_s30 }
  0xb3   : > { %p2938_p2 = pnand %p2936_p0, %p3253_p8  ;;  %p2945_p4 = por %p2944_p9, %p2943_p7 }
  0xb5   : > { %p2939_p5 = pneg %p2938_p2 }
  0xb7   : > { %p2946_p10 = pnand %p2945_p4, %p2939_p5 }
  0xb9   : > { %2949 = shalt.err (!%p2946_p10)
}
  0xba   : > { %s3785_s26 = smov 4   ;;  %s2950_s2 = scalar_lea.hbm %s3756_s8, 1024 }
  0xbb   : > { %2573 = dma.hbm_to_vmem [thread:$0]  (!%p3237_p6), %s3784_s6, 1024, %s348_s29, [#allocation12], %s3782_s22, %s3782_s22, %s3785_s26  }
  0xbc   : > { %p2951_p1 = scmp.ne.s32.totalorder %s3756_s8, %s2950_s2  ;;  %p2957_p12 = scmp.lt.u32.totalorder %s2950_s2, %s3756_s8 }
  0xbe   : > { %p2953_p3 = pnand %p2951_p1, %p3253_p8 }
  0xc0   : > { %p2954_p11 = pneg %p2953_p3 }
  0xc2   : > { %p2959_p13 = pnand %p2957_p12, %p2954_p11 }
  0xc4   : > { %2962 = shalt.err (!%p2959_p13)
}
  0xc5   : > { %s2963_s18 = scalar_lea.vmem %s374_s17, 1024  ;;  %p2971_p7 = scmp.lt.s32.totalorder %s374_s17, %s374_s17 }
  0xc6   : > { %p2964_p0 = scmp.ne.s32.totalorder %s374_s17, %s2963_s18  ;;  %p2972_p9 = scmp.lt.s32.totalorder %s2963_s18, %s2963_s18 }
  0xc8   : > { %p2966_p2 = pnand %p2964_p0, %p3253_p8  ;;  %p2973_p4 = por %p2972_p9, %p2971_p7 }
  0xca   : > { %p2967_p5 = pneg %p2966_p2 }
  0xcc   : > { %p2974_p10 = pnand %p2973_p4, %p2967_p5 }
  0xce   : > { %2977 = shalt.err (!%p2974_p10)
}
  0xcf   : > { %2579 = dma.hbm_to_vmem [thread:$0]  (!%p3237_p6), %s3756_s8, 1024, %s374_s17, [#allocation15], %s3782_s22, %s3782_s22, %s3785_s26  }
  0xd0   : > { %s2120_s23 = sadd.s32 4294967294, %s3124_s16   ;;  %s3405_s11 = sadd.s32 1, %s3124_s16  }
  0xd1   : > { %s39_s24 = sadd.s32 1, %s3120_s15  ;;  %s36_s30 = ssub.s32 %s3124_s16, %s3405_s11 }
  0xd2   : > { %p46_p8 = scmp.ne.s32.totalorder %s3120_s15, %s3116_s14  ;;  %p37_p1 = scmp.eq.s32.totalorder %s36_s30, 0 }
  0xd3   : > { %p47_p3 = scmp.eq.s32.totalorder %s3124_s16, 0  ;;  %p52_p11 = scmp.ne.s32.totalorder %s3116_s14, %s3112_s13 }
  0xd4   : > { %p270_p12 = scmp.eq.s32.totalorder %s3221_s19, 1  ;;  %p3786_p0 = scmp.eq.s32.totalorder %s3221_s19, 0 }
  0xd5   : > { %s3417_s3 = scalar_select %p37_p1, %s3120_s15, %s39_s24  }
  0xd6   : > { %p48_p13 = por %p47_p3, %p46_p8  ;;  %p3421_p2 = por %p3786_p0, %p52_p11 }
  0xd7   : > { %p3425_p6 = por %p270_p12, %p46_p8  ;;  %p276_p5 = scmp.eq.s32.totalorder %s2120_s23, 1 }
  0xd8   : > { %p2598_p7 = scmp.lt.s32.totalorder %s3124_s16, 2  ;;  %s3431_s28 = sand.u32 1, %s3120_s15  }
  0xd9   : > { %s3788_s17 = scalar_select %p3425_p6, 1, 0 }
  0xda   : > { %p3433_p9 = por %p276_p5, %p52_p11  ;;  %s2130_s2 = sshll.u32 %s3431_s28, 2 }
  0xdb   : > { %s2131_s27 = sshll.u32 %s3124_s16, 6  ;;  %s3790_s0 = sld [smem:[#allocation25_spill]] }
  0xdc   : > { %s3789_s25 = scalar_select %p3433_p9, 1, 0 }
  0xdd   : > { %s394_s18 = scalar_lea.vmem [#allocation2], %s2130_s2  ;;  %p3444_p4 = pnand %p2598_p7, %p48_p13 }
  0xde   : > { %s401_s29 = sshll.u32 %s394_s18, 4  ;;  %s391_s24 = scalar_lea.sflag [#allocation3], %s3431_s28  ;;  %s3448_s29 = int_to_ptr.vmem [resolvable:$true] %s401_s29 }
  0xdf   : > { %p2980_p8 = pneg %p3444_p4 }
  0xe1   : > { %s3442_s21 = scalar_lea.hbm %s3790_s0, %s2131_s27  ;;  %s2983_s9 = scalar_lea.hbm %s3790_s0, 128 }
  0xe2   : > { %s2978_s30 = scalar_lea.hbm %s3442_s21, 64  ;;  %p2984_p11 = scmp.lt.u32.totalorder %s3442_s21, %s3790_s0 }
  0xe3   : > { %p2979_p10 = scmp.ne.s32.totalorder %s3442_s21, %s2978_s30  ;;  %p2985_p12 = scmp.lt.u32.totalorder %s2983_s9, %s2978_s30 }
  0xe4   : > { %p2987_p0 = scmp.lt.u32.totalorder %s2978_s30, %s3442_s21 }
  0xe5   : > { %p2981_p1 = pnand %p2980_p8, %p2979_p10  ;;  %p2986_p13 = por %p2985_p12, %p2984_p11 }
  0xe7   : > { %p2982_p3 = pneg %p2981_p1  ;;  %p2988_p5 = por %p2987_p0, %p2986_p13 }
  0xe9   : > { %p2989_p7 = pnand %p2988_p5, %p2982_p3 }
  0xeb   : > { %2992 = shalt.err (!%p2989_p7)
}
  0xec   : > { %s2993_s23 = scalar_lea.vmem %s3448_s29, 64  ;;  %s3139_s2 = smov [#allocation2]  }
  0xed   : > { %p2994_p10 = scmp.ne.s32.totalorder %s3448_s29, %s2993_s23  ;;  %s2998_s27 = sshll.u32 %s3139_s2, 4  ;;  %s2999_s27 = int_to_ptr.vmem [resolvable:$false] %s2998_s27 }
  0xee   : > { %s3000_s12 = scalar_lea.vmem %s2999_s27, 128  ;;  %p3001_p6 = scmp.lt.s32.totalorder %s3448_s29, %s2999_s27 }
  0xef   : > { %p2996_p1 = pnand %p2994_p10, %p2980_p8  ;;  %p3002_p11 = scmp.lt.s32.totalorder %s3000_s12, %s2993_s23 }
  0xf1   : > { %p2997_p9 = pneg %p2996_p1  ;;  %p3003_p12 = por %p3002_p11, %p3001_p6 }
  0xf3   : > { %p3004_p13 = pnand %p3003_p12, %p2997_p9 }
  0xf5   : > { %3007 = shalt.err (!%p3004_p13)
}
  0xf6   : > { %2583 = dma.hbm_to_vmem [thread:$0]  (!%p3444_p4), %s3442_s21, 64, %s3448_s29, %s391_s24  }
  0xf7   : > { %s3792_s30 = sshll.u32 %s3431_s28, 3  ;;  %s408_s2 = sand.u32 1, %s3124_s16  }
  0xf8   : > { %s412_s9 = scalar_lea.vmem [#allocation5], %s3792_s30  ;;  %s2259_s27 = sshll.u32 %s3124_s16, 7 }
  0xf9   : > { %s419_s18 = sshll.u32 %s412_s9, 4  ;;  %s3486_s0 = scalar_lea.hbm %s3749_s1, %s2259_s27  ;;  %s3480_s18 = int_to_ptr.vmem [resolvable:$true] %s419_s18 }
  0xfa   : > { %s3488_s4 = scalar_lea.sflag [#allocation6], %s408_s2  ;;  %s3008_s6 = scalar_lea.hbm %s3486_s0, 128 }
  0xfb   : > { %p3009_p6 = scmp.ne.s32.totalorder %s3486_s0, %s3008_s6  ;;  %s3013_s29 = scalar_lea.hbm %s3749_s1, 256 }
  0xfc   : > { %p3014_p0 = scmp.lt.u32.totalorder %s3486_s0, %s3749_s1  ;;  %p3015_p5 = scmp.lt.u32.totalorder %s3013_s29, %s3008_s6 }
  0xfd   : > { %p3011_p9 = pnand %p3009_p6, %p2980_p8  ;;  %p3017_p10 = scmp.lt.u32.totalorder %s3008_s6, %s3486_s0 }
  0xfe   : > { %p3016_p7 = por %p3015_p5, %p3014_p0 }
  0xff   : > { %p3012_p3 = pneg %p3011_p9 }
 0x100   : > { %p3018_p1 = por %p3017_p10, %p3016_p7 }
 0x102   : > { %p3019_p11 = pnand %p3018_p1, %p3012_p3 }
 0x104   : > { %3022 = shalt.err (!%p3019_p11)
}
 0x105   : > { %s3023_s9 = scalar_lea.vmem %s3480_s18, 128  ;;  %s3140_s2 = smov [#allocation5]  }
 0x106   : > { %p3024_p12 = scmp.ne.s32.totalorder %s3480_s18, %s3023_s9  ;;  %s3028_s27 = sshll.u32 %s3140_s2, 4  ;;  %s3029_s27 = int_to_ptr.vmem [resolvable:$false] %s3028_s27 }
 0x107   : > { %s3030_s23 = scalar_lea.vmem %s3029_s27, 256  ;;  %p3031_p9 = scmp.lt.s32.totalorder %s3480_s18, %s3029_s27 }
 0x108   : > { %p3026_p13 = pnand %p3024_p12, %p2980_p8  ;;  %p3032_p0 = scmp.lt.s32.totalorder %s3030_s23, %s3023_s9 }
 0x10a   : > { %p3027_p6 = pneg %p3026_p13  ;;  %p3033_p5 = por %p3032_p0, %p3031_p9 }
 0x10c   : > { %p3034_p7 = pnand %p3033_p5, %p3027_p6 }
 0x10e   : > { %3037 = shalt.err (!%p3034_p7)
}
 0x10f   : > { %2586 = dma.hbm_to_vmem [thread:$0]  (!%p3444_p4), %s3486_s0, 128, %s3480_s18, %s3488_s4, %s3782_s22, %s3782_s22, %s3785_s26  }
 0x110   : > { %p3793_p8 = scmp.ne.s32.totalorder %s3776_s20, 0 }
 0x111   : > { %s3520_s6 = sand.u32 (!%p3793_p8), 1, %s3116_s14  }
 0x112   : > { %431 = sbr.rel (%p3793_p8) target bundleno = 4066 (0xfe2), region = 60  ;;  %s2136_s12 = sshll.u32 (!%p3793_p8), %s3520_s6, 2 }
 0x113   : > { %s434_s28 = scalar_lea.sflag (!%p3793_p8), [#allocation3], %s3520_s6  ;;  %s3524_s21 = scalar_lea.vmem (!%p3793_p8), [#allocation2], %s2136_s12 }
 0x119   : > { %3083 = dma.done.wait (%p3421_p2), %s434_s28, 64  }
 0x11a   : > { %3085 = vsyncadd (%p3421_p2), %s434_s28, 4294967232  ;;  %s442_s0 = sand.u32 1, %s3221_s19   ;;  %s2137_s4 = sshll.u32 %s3520_s6, 3 }
 0x11b   : > { %s443_s20 = scalar_lea.sflag [#allocation6], %s442_s0  ;;  %s3534_s22 = scalar_lea.vmem [#allocation5], %s2137_s4 }
 0x11c   : > { %3087 = dma.done.wait (%p3421_p2), %s443_s20, 128  }
 0x11d   : > { %3089 = vsyncadd (%p3421_p2), %s443_s20, 4294967168  ;;  %p3794_p4 = scmp.eq.s32.totalorder %s3221_s19, 0 }
 0x11f   : > { %3091 = dma.done.wait (%p3794_p4), [#allocation6], 1024   ;;  %p3795_p3 = pmov %p3794_p4 }
 0x121   : > { %3093 = vsyncadd (%p3795_p3), [#allocation6], 4294966272  ;;  %p3796_p10 = pmov %p3795_p3 }
 0x122   : > { %p3797_p1 = pmov %p3795_p3 }
 0x123   : > { %3095 = dma.done.wait (%p3796_p10), [#allocation9], 5120  }
 0x124   : > { %3097 = vsyncadd (%p3797_p1), [#allocation9], 4294962176  ;;  %p3798_p11 = pmov %p3797_p1 }
 0x125   : > { %p3799_p12 = pmov %p3797_p1 }
 0x126   : > { %3099 = dma.done.wait (%p3798_p11), [#allocation12], 4096  }
 0x127   : > { %3101 = vsyncadd (%p3799_p12), [#allocation12], 4294963200  ;;  %p3800_p2 = pmov %p3797_p1 }
 0x128   : > { %p3801_p13 = pmov %p3797_p1 }
 0x129   : > { %3103 = dma.done.wait (%p3800_p2), [#allocation15], 2048  }
 0x12a   : > { %3105 = vsyncadd (%p3801_p13), [#allocation15], 4294965248  ;;  %v3141_v0 = vmov 0.0   ;;  %vm3142_vm0 = vmmov 0   ;;  %v2655_v1 = vld [vmem:[#allocation7] sm:$0xff]   ;;  %v2656_v2 = vld [vmem:[#allocation7 + $0x8] sm:$0xff]  }
 0x12b   : > { %2340 = vmatprep.subr.bf16.mxu0 %v3141_v0  ;;  %2356 = vmatprep.mubr.msk.bf16.mxu0 %vm3142_vm0, %v3141_v0  ;;  %v2657_v3 = vld [vmem:[#allocation7 + $0x10] sm:$0xff]   ;;  %v2665_v5 = vld [vmem:[#allocation8] ss:$12 sps:$4 sm:$0xff]   ;;  %v2658_v6 = vld [vmem:[#allocation7 + $0x18] sm:$0xff]   ;;  %v3143_v34 = vmov 0   ;;  %s3802_s10 = sld [smem:[#allocation31_spill]] }
 0x12c   : > { %2341 = vmatpush3.bf16.msra.mxu0 %v2655_v1  ;;  %v2663_v4 = vld [vmem:[#allocation8 + $0x4] ss:$12 sps:$4 sm:$0xff]   ;;  %v2667_v7 = vld [vmem:[#allocation8 + $0x1c] ss:$12 sps:$4 sm:$0xff]   ;;  %v2671_v9 = vld [vmem:[#allocation8 + $0x34] ss:$12 sps:$4 sm:$0xff]   ;;  %830 = vmatprep.mubr.bf16.mxu1 %v3143_v34 }
 0x12d   : > { %2342 = vmatprep.subr.bf16.mxu0 %v3141_v0  ;;  %798 = vmatprep.subr.bf16.mxu1 %v2663_v4  ;;  %v2669_v8 = vld [vmem:[#allocation8 + $0x18] ss:$12 sps:$4 sm:$0xff]   ;;  %v2673_v11 = vld [vmem:[#allocation8 + $0x30] ss:$12 sps:$4 sm:$0xff]   ;;  %v2660_v13 = vld [vmem:[#allocation7 + $0x28] sm:$0xff]   ;;  %vm938_vm1 = vcmask 1043456  }
 0x12e   : > { %799 = vmatpush1.bf16.msra.mxu1 %v2665_v5  ;;  %v2659_v10 = vld [vmem:[#allocation7 + $0x20] sm:$0xff]   ;;  %v2675_v12 = vld [vmem:[#allocation8 + $0x4c] ss:$12 sps:$4 sm:$0xff]   ;;  %v2677_v14 = vld [vmem:[#allocation8 + $0x48] ss:$12 sps:$4 sm:$0xff]   ;;  %vm921_vm2 = vcmask 64512  }
 0x12f   : > { %800 = vmatprep.subr.bf16.mxu1 %v2667_v7  ;;  %v2679_v15 = vld [vmem:[#allocation8 + $0x64] ss:$12 sps:$4 sm:$0xff]   ;;  %v2662_v17 = vld [vmem:[#allocation7 + $0x38] sm:$0xff]   ;;  %v2681_v18 = vld [vmem:[#allocation8 + $0x60] ss:$12 sps:$4 sm:$0xff]   ;;  %vm1406_vm3 = vcmask 130048  }
 0x130   : > { %2343 = vmatpush3.bf16.msra.mxu0 %v2656_v2  ;;  %v2661_v16 = vld [vmem:[#allocation7 + $0x30] sm:$0xff]   ;;  %v2683_v19 = vld [vmem:[#allocation8 + $0x7c] ss:$12 sps:$4 sm:$0xff]   ;;  %v2685_v20 = vld [vmem:[#allocation8 + $0x78] ss:$12 sps:$4 sm:$0xff]   ;;  %s2256_s24 = sshll.u32 %s3221_s19, 7 }
 0x131   : > { %2344 = vmatprep.subr.bf16.mxu0 %v3141_v0  ;;  %v2687_v21 = vld [vmem:[#allocation8 + $0x94] ss:$12 sps:$4 sm:$0xff]   ;;  %v528_v22 = vld [vmem:[%s3524_s21] sm:$0xf]  ;;  %v2689_v24 = vld [vmem:[#allocation8 + $0x90] ss:$12 sps:$4 sm:$0xff]  }
 0x132   : > { %801 = vmatpush1.bf16.msra.mxu1 %v2669_v8  ;;  %v2666_v23 = vld [vmem:[#allocation8 + $0x8] ss:$12 sps:$4 sm:$0xff]   ;;  %v2670_v25 = vld [vmem:[#allocation8 + $0x20] ss:$12 sps:$4 sm:$0xff]   ;;  %v2674_v26 = vld [vmem:[#allocation8 + $0x38] ss:$12 sps:$4 sm:$0xff]  }
 0x133   : > { %802 = vmatprep.subr.bf16.mxu1 %v2671_v9  ;;  %v2678_v27 = vld [vmem:[#allocation8 + $0x50] ss:$12 sps:$4 sm:$0xff]   ;;  %v2682_v28 = vld [vmem:[#allocation8 + $0x68] ss:$12 sps:$4 sm:$0xff]   ;;  %v2686_v29 = vld [vmem:[#allocation8 + $0x80] ss:$12 sps:$4 sm:$0xff]  }
 0x134   : > { %2345 = vmatpush3.bf16.msra.mxu0 %v2657_v3  ;;  %v2690_v30 = vld [vmem:[#allocation8 + $0x98] ss:$12 sps:$4 sm:$0xff]   ;;  %v2693_v32 = vld [vmem:[#allocation8 + $0xa8] ss:$12 sps:$4 sm:$0xff]   ;;  %v2694_v33 = vld [vmem:[#allocation8 + $0xb0] ss:$12 sps:$4 sm:$0xff]  }
 0x135   : > { %2346 = vmatprep.subr.bf16.mxu0 %v3141_v0  ;;  %v2691_v31 = vld [vmem:[#allocation8 + $0xac] ss:$12 sps:$4 sm:$0xff]   ;;  %v2695_v4 = vld [vmem:[#allocation11] sm:$0xff]   ;;  %v2697_v7 = vld [vmem:[#allocation11 + $0x10] sm:$0xff]   ;;  %s515_s30 = scalar_lea.vmem [#allocation17], %s2137_s4  ;;  %s3803_s23 = sld [smem:[#allocation32_spill]] }
 0x136   : > { %803 = vmatpush1.bf16.msra.mxu1 %v2673_v11  ;;  %v2146_v35 = vld [vmem:[%s3802_s10] ss:$0 sm:$0xff]  ;;  %v2699_v9 = vld [vmem:[#allocation11 + $0x20] sm:$0xff]   ;;  %v2701_v11 = vld [vmem:[#allocation11 + $0x30] sm:$0xff]   ;;  %s1961_s9 = sshll.u32 %s515_s30, 4  ;;  %s1948_s19 = scalar_lea.sflag [#allocation4], %s3520_s6  ;;  %s3706_s9 = int_to_ptr.vmem [resolvable:$true] %s1961_s9 }
 0x137   : > { %804 = vmatprep.subr.bf16.mxu1 %v2675_v12  ;;  %v2698_v8 = vld [vmem:[#allocation11 + $0x18] sm:$0xff]   ;;  %s3038_s28 = scalar_lea.vmem %s3706_s9, 128  ;;  %p3804_p9 = scmp.ne.s32.totalorder %s3788_s17, 0 }
 0x138   : > { %2347 = vmatpush3.bf16.msra.mxu0 %v2658_v6  ;;  %v2696_v6 = vld [vmem:[#allocation11 + $0x8] sm:$0xff]   ;;  %v2702_v12 = vld [vmem:[#allocation11 + $0x38] sm:$0xff]   ;;  %p3039_p6 = scmp.ne.s32.totalorder %s3706_s9, %s3038_s28  ;;  %s3144_s4 = smov [#allocation17]  }
 0x139   : > { %2348 = vmatprep.subr.bf16.mxu0 %v3141_v0  ;;  %s3042_s21 = sshll.u32 %s3144_s4, 4  ;;  %s3043_s21 = int_to_ptr.vmem [resolvable:$false] %s3042_s21 }
 0x13a   : > { %805 = vmatpush1.bf16.msra.mxu1 %v2677_v14  ;;  %p3040_p0 = pnand %p3039_p6, %p3804_p9  ;;  %s3044_s0 = scalar_lea.vmem %s3043_s21, 256 }
 0x13b   : > { %806 = vmatprep.subr.bf16.mxu1 %v2679_v15  ;;  %s3704_s12 = scalar_lea.hbm %s3803_s23, %s2256_s24  ;;  %p3045_p7 = scmp.lt.s32.totalorder %s3706_s9, %s3043_s21 }
 0x13c   : > { %2349 = vmatpush3.bf16.msra.mxu0 %v2659_v10  ;;  %v2700_v10 = vld [vmem:[#allocation11 + $0x28] sm:$0xff]   ;;  %p3041_p5 = pneg %p3040_p0  ;;  %p3046_p8 = scmp.lt.s32.totalorder %s3044_s0, %s3038_s28 }
 0x13d   : > { %2350 = vmatprep.subr.bf16.mxu0 %v3141_v0 }
 0x13e   : > { %807 = vmatpush1.bf16.msra.mxu1 %v2681_v18  ;;  %v2703_v18 = vld [vmem:[#allocation10] ss:$8 sps:$4 sm:$0xff]   ;;  %p3047_p4 = por %p3046_p8, %p3045_p7 }
 0x13f   : > { %808 = vmatprep.subr.bf16.mxu1 %v2683_v19  ;;  %v2705_v19 = vld [vmem:[#allocation10 + $0x4] ss:$8 sps:$4 sm:$0xff]  }
 0x140   : > { %2351 = vmatpush3.bf16.msra.mxu0 %v2660_v13  ;;  %p3048_p3 = pnand %p3047_p4, %p3041_p5 }
 0x141   : > { %2352 = vmatprep.subr.bf16.mxu0 %v3141_v0 }
 0x142   : > { %809 = vmatpush1.bf16.msra.mxu1 %v2685_v20  ;;  %v2708_v20 = vld [vmem:[#allocation10 + $0x14] ss:$8 sps:$4 sm:$0xff]  }
 0x143   : > { %810 = vmatprep.subr.bf16.mxu1 %v2687_v21  ;;  %v2715_v21 = vld [vmem:[#allocation11 + $0x40] sm:$0xff]  }
 0x144   : > { %2353 = vmatpush3.bf16.msra.mxu0 %v2661_v16 }
 0x145   : > { %2354 = vmatprep.subr.bf16.mxu0 %v3141_v0 }
 0x146   : > { %811 = vmatpush1.bf16.msra.mxu1 %v2689_v24  ;;  %v2709_v24 = vld [vmem:[#allocation10 + $0x20] ss:$8 sps:$4 sm:$0xff]  }
 0x147   : > { %812 = vmatprep.subr.bf16.mxu1 %v2691_v31 }
 0x148   : > { %2355 = vmatpush3.bf16.msra.mxu0 %v2662_v17 }
 0x149   : > { %2360 = vmatprep.subr.bf16.mxu0 %v3141_v0 }
 0x14a   : > { %813 = vmatpush1.bf16.msra.mxu1 %v2693_v32 }
 0x14b   : > { %2357 = vmatmul.mubr.bf16.vlgmr.msra.gmra.mrb[0].mxu0 %v528_v22  ;;  %2380 = vmatprep.subr.bf16.mxu1 %v3141_v0  ;;  %v2706_v22 = vld [vmem:[#allocation10 + $0x10] ss:$8 sps:$4 sm:$0xff]  }
 0x14c   : > { %2361 = vmatpush3.bf16.msra.mxu0 %v2666_v23  ;;  %2376 = vmatprep.mubr.msk.bf16.mxu0 %vm3142_vm0, %v3141_v0  ;;  %v2711_v23 = vld [vmem:[#allocation10 + $0x24] ss:$8 sps:$4 sm:$0xff]  }
 0x14d   : > { %2362 = vmatprep.subr.bf16.mxu0 %v3141_v0 }
 0x150   : > { %2363 = vmatpush3.bf16.msra.mxu0 %v2670_v25  ;;  %v2714_v25 = vld [vmem:[#allocation10 + $0x34] ss:$8 sps:$4 sm:$0xff]  }
 0x151   : > { %2364 = vmatprep.subr.bf16.mxu0 %v3141_v0 }
 0x154   : > { %2365 = vmatpush3.bf16.msra.mxu0 %v2674_v26  ;;  %v2712_v26 = vld [vmem:[#allocation10 + $0x30] ss:$8 sps:$4 sm:$0xff]  }
 0x155   : > { %2366 = vmatprep.subr.bf16.mxu0 %v3141_v0 }
 0x158   : > { %2367 = vmatpush3.bf16.msra.mxu0 %v2678_v27 }
 0x159   : > { %2368 = vmatprep.subr.bf16.mxu0 %v3141_v0 }
 0x15c   : > { %2369 = vmatpush3.bf16.msra.mxu0 %v2682_v28 }
 0x15d   : > { %2370 = vmatprep.subr.bf16.mxu0 %v3141_v0 }
 0x160   : > { %2371 = vmatpush3.bf16.msra.mxu0 %v2686_v29 }
 0x161   : > { %2372 = vmatprep.subr.bf16.mxu0 %v3141_v0 }
 0x164   : > { %2373 = vmatpush3.bf16.msra.mxu0 %v2690_v30 }
 0x165   : > { %2374 = vmatprep.subr.bf16.mxu0 %v3141_v0 }
 0x168   : > { %2375 = vmatpush3.bf16.msra.mxu0 %v2694_v33  ;;  %v2718_v33 = vld [vmem:[#allocation10 + $0x44] ss:$8 sps:$4 sm:$0xff]  }
 0x169   : > { %2412 = vmatprep.subr.bf16.mxu0 %v3141_v0 }
 0x21e   : > { %v631_v36 = vpop.f32.mrb[0].mxu0 }
 0x21f   : > { %v3583_v37 = vadd.f32 %v2146_v35, %v631_v36  ;;  %v2358_v38 = vpop.f32.mrb[1].mxu0  ;;  %v2719_v35 = vld [vmem:[#allocation11 + $0x48] sm:$0xff]   ;;  %v2722_v36 = vld [vmem:[#allocation10 + $0x54] ss:$8 sps:$4 sm:$0xff]  }
 0x220   : > { %v634_v39 = vpop.f32.mrb[2].mxu0  ;;  %v2720_v38 = vld [vmem:[#allocation10 + $0x50] ss:$8 sps:$4 sm:$0xff]  }
 0x221   : > { %v669_v40 = vpack.c.bf16 %v3583_v37, %v3583_v37  ;;  %v2359_v41 = vpop.f32.mrb[3].mxu0  ;;  %v2723_v39 = vld [vmem:[#allocation11 + $0x50] sm:$0xff]  }
 0x222   : > { %v2727_v41 = vld [vmem:[#allocation11 + $0x58] sm:$0xff]  }
 0x223   : > { %831 = vmatmul.mubr.bf16.vlgmr.msra.gmra.mrb[0].mxu1 %v669_v40  ;;  %2377 = vmatmul.mubr.bf16.vlgmr.msra.gmra.mrb[4].mxu0 %v669_v40  ;;  %v2724_v40 = vld [vmem:[#allocation10 + $0x60] ss:$8 sps:$4 sm:$0xff]  }
 0x224   : > { %2382 = vmatprep.mubr.msk.bf16.mxu1 %vm3142_vm0, %v3141_v0  ;;  %2428 = vmatprep.mubr.msk.bf16.mxu0 %vm3142_vm0, %v3141_v0 }
 0x225   : > { %2413 = vmatpush3.bf16.msra.mxu0 %v2715_v21 }
 0x226   : > { %2414 = vmatprep.subr.bf16.mxu0 %v3141_v0 }
 0x229   : > { %2415 = vmatpush3.bf16.msra.mxu0 %v2719_v35 }
 0x22a   : > { %2416 = vmatprep.subr.bf16.mxu0 %v3141_v0 }
 0x22d   : > { %2417 = vmatpush3.bf16.msra.mxu0 %v2723_v39 }
 0x22e   : > { %2418 = vmatprep.subr.bf16.mxu0 %v3141_v0 }
 0x231   : > { %2419 = vmatpush3.bf16.msra.mxu0 %v2727_v41 }
 0x232   : > { %2420 = vmatprep.subr.bf16.mxu0 %v3141_v0 }
 0x2f6   : > { %v832_v42 = vpop.f32.mrb[0].mxu1  ;;  %v873_v43 = vpop.f32.mrb[4].mxu0 }
 0x2f7   : > { %v834_v44 = vpop.f32.mrb[1].mxu1  ;;  %v2378_v45 = vpop.f32.mrb[5].mxu0  ;;  %v934_v51 = vpack.c.bf16 %v873_v43, %v873_v43  ;;  %v879_v52 = vpack.c.bf16 %v832_v42, %v832_v42  ;;  %v2728_v42 = vld [vmem:[#allocation10 + $0x70] ss:$8 sps:$4 sm:$0xff]   ;;  %v2730_v43 = vld [vmem:[#allocation10 + $0x74] ss:$8 sps:$4 sm:$0xff]  }
 0x2f8   : > { %v880_v46 = vpack.c.bf16 %v834_v44, %v834_v44  ;;  %v836_v47 = vpop.f32.mrb[2].mxu1  ;;  %v876_v48 = vpop.f32.mrb[6].mxu0  ;;  %v2731_v44 = vld [vmem:[#allocation11 + $0x60] sm:$0xff]   ;;  %v2732_v45 = vld [vmem:[%s3534_s22] sm:$0xff]  }
 0x2f9   : > { %v837_v49 = vpop.f32.mrb[3].mxu1  ;;  %v2379_v50 = vpop.f32.mrb[7].mxu0  ;;  %v940_v53 = vsel %vm938_vm1, %v934_v51, 0  ;;  %2421 = vmatpush3.bf16.msra.mxu0 %v2731_v44  ;;  %v2734_v47 = vld [vmem:[#allocation11 + $0x70] sm:$0xff]   ;;  %v2735_v48 = vld [vmem:[#allocation11 + $0x78] sm:$0xff]  }
 0x2fa   : > { %2381 = vmatpush3.bf16.xpose.msra.mxu1 %v880_v46  ;;  %v2733_v46 = vld [vmem:[#allocation11 + $0x68] sm:$0xff]   ;;  %2422 = vmatprep.subr.bf16.mxu0 %v3141_v0 }
 0x2fb   : > { %2386 = vmatprep.subr.bf16.mxu1 %v3141_v0 }
 0x2fd   : > { %2423 = vmatpush3.bf16.msra.mxu0 %v2733_v46  ;;  %v2745_v46 = vld [vmem:[#allocation13 + $0x8] sm:$0xff]  }
 0x2fe   : > { %2424 = vmatprep.subr.bf16.mxu0 %v3141_v0 }
 0x301   : > { %2383 = vmatmul.mubr.bf16.vlgmr.msra.gmra.mrb[4].mxu1 %v879_v52  ;;  %2425 = vmatpush3.bf16.msra.mxu0 %v2734_v47  ;;  %v2746_v47 = vld [vmem:[#allocation13 + $0x10] sm:$0xff]  }
 0x302   : > { %2387 = vmatpush3.bf16.msra.mxu1 %v940_v53  ;;  %2388 = vmatprep.mubr.msk.bf16.mxu1 %vm3142_vm0, %v3141_v0 }
 0x303   : > { %2392 = vmatprep.subr.bf16.mxu1 %v3141_v0  ;;  %2426 = vmatprep.subr.bf16.mxu0 %v3141_v0 }
 0x305   : > { %2427 = vmatpush3.bf16.msra.mxu0 %v2735_v48  ;;  %v2747_v48 = vld [vmem:[#allocation13 + $0x18] sm:$0xff]  }
 0x306   : > { %2432 = vmatprep.subr.bf16.mxu0 %v3141_v0 }
 0x3d4   : > { %v915_v54 = vpop.f32.mrb[4].mxu1 }
 0x3d5   : > { %v2384_v55 = vpop.f32.mrb[5].mxu1  ;;  %v922_v56 = vsel %vm921_vm2, %v915_v54, -inf }
 0x3d6   : > { %923 = vmax.xlane.f32.xlu0 %v922_v56  ;;  %v918_v57 = vpop.f32.mrb[6].mxu1 }
 0x3d7   : > { %v2385_v58 = vpop.f32.mrb[7].mxu1 }
 0x3d8   : > { %v2188_v58 = vld [vmem:[%s3802_s10 + $0x1] ss:$0 sm:$0xff] }
 0x463   : > { %v924_v59 = vpop.xlane.xlu0 %923 }
 0x464   : > { %v925_v60 = vsub.f32 %v915_v54, %v924_v59 }
 0x466   : > { %v926_v61 = vmul.f32 1.442695, %v925_v60  ;;  %v2189_v60 = vld [vmem:[%s3802_s10 + $0x2] ss:$0 sm:$0xff] }
 0x468   : > { %2768 = vpow2.f32 %v926_v61 }
 0x472   : > { %v2769_v62 = vpop.eup %2768 }
 0x473   : > { %v928_v63 = vsel %vm921_vm2, %v2769_v62, 0.0 }
 0x474   : > { %929 = vadd.xlane.f32.xlu0 %v928_v63 }
 0x501   : > { %v930_v1 = vpop.xlane.xlu0 %929 }
 0x502   : > { %2770 = vrcp.f32 %v930_v1 }
 0x50c   : > { %v2771_v2 = vpop.eup %2770 }
 0x50d   : > { %v932_v3 = vmul.f32 %v2771_v2, %v2769_v62 }
 0x50f   : > { %v933_v5 = vpack.c.bf16 %v932_v3, %v932_v3 }
 0x511   : > { %2389 = vmatmul.mubr.msk.bf16.vlgmr.msra.gmra.mrb[8].mxu1 %vm921_vm2, %v933_v5 }
 0x512   : > { %2393 = vmatpush3.bf16.msra.mxu1 %v2695_v4  ;;  %2408 = vmatprep.mubr.msk.bf16.mxu1 %vm3142_vm0, %v3141_v0 }
 0x513   : > { %2394 = vmatprep.subr.bf16.mxu1 %v3141_v0 }
 0x516   : > { %2395 = vmatpush3.bf16.msra.mxu1 %v2696_v6 }
 0x517   : > { %2396 = vmatprep.subr.bf16.mxu1 %v3141_v0 }
 0x51a   : > { %2397 = vmatpush3.bf16.msra.mxu1 %v2697_v7 }
 0x51b   : > { %2398 = vmatprep.subr.bf16.mxu1 %v3141_v0 }
 0x51e   : > { %2399 = vmatpush3.bf16.msra.mxu1 %v2698_v8 }
 0x51f   : > { %2400 = vmatprep.subr.bf16.mxu1 %v3141_v0 }
 0x522   : > { %2401 = vmatpush3.bf16.msra.mxu1 %v2699_v9 }
 0x523   : > { %2402 = vmatprep.subr.bf16.mxu1 %v3141_v0 }
 0x526   : > { %2403 = vmatpush3.bf16.msra.mxu1 %v2700_v10 }
 0x527   : > { %2404 = vmatprep.subr.bf16.mxu1 %v3141_v0 }
 0x52a   : > { %2405 = vmatpush3.bf16.msra.mxu1 %v2701_v11 }
 0x52b   : > { %2406 = vmatprep.subr.bf16.mxu1 %v3141_v0 }
 0x52e   : > { %2407 = vmatpush3.bf16.msra.mxu1 %v2702_v12 }
 0x52f   : > { %1321 = vmatprep.subr.bf16.mxu1 %v2705_v19 }
 0x5e4   : > { %v976_v13 = vpop.f32.mrb[8].mxu1 }
 0x5e5   : > { %v998_v14 = vpack.c.bf16 %v976_v13, %v976_v13  ;;  %v2390_v15 = vpop.f32.mrb[9].mxu1 }
 0x5e6   : > { %v979_v16 = vpop.f32.mrb[10].mxu1 }
 0x5e7   : > { %v2391_v17 = vpop.f32.mrb[11].mxu1  ;;  %2409 = vmatmul.mubr.bf16.vlgmr.msra.gmra.mrb[12].mxu1 %v998_v14 }
 0x5e8   : > { %1353 = vmatprep.mubr.bf16.mxu1 %v3143_v34  ;;  %1322 = vmatpush1.bf16.msra.mxu1 %v2703_v18  ;;  %v2716_v34 = vld [vmem:[#allocation10 + $0x40] ss:$8 sps:$4 sm:$0xff]  }
 0x5e9   : > { %1323 = vmatprep.subr.bf16.mxu1 %v2708_v20 }
 0x5ec   : > { %1324 = vmatpush1.bf16.msra.mxu1 %v2706_v22 }
 0x5ed   : > { %1325 = vmatprep.subr.bf16.mxu1 %v2711_v23 }
 0x5f0   : > { %1326 = vmatpush1.bf16.msra.mxu1 %v2709_v24 }
 0x5f1   : > { %1327 = vmatprep.subr.bf16.mxu1 %v2714_v25  ;;  %v2736_v25 = vld [vmem:[#allocation11 + $0x80] sm:$0xff]  }
 0x5f4   : > { %1328 = vmatpush1.bf16.msra.mxu1 %v2712_v26 }
 0x5f5   : > { %1329 = vmatprep.subr.bf16.mxu1 %v2718_v33  ;;  %v2743_v33 = vld [vmem:[#allocation11 + $0xb8] sm:$0xff]  }
 0x5f8   : > { %1330 = vmatpush1.bf16.msra.mxu1 %v2716_v34 }
 0x5f9   : > { %1331 = vmatprep.subr.bf16.mxu1 %v2722_v36 }
 0x5fc   : > { %1332 = vmatpush1.bf16.msra.mxu1 %v2720_v38 }
 0x6ba   : > { %v1081_v27 = vpop.f32.mrb[12].mxu1 }
 0x6bb   : > { %v1087_v28 = vadd.f32 %v1081_v27, %v3583_v37  ;;  %v2410_v29 = vpop.f32.mrb[13].mxu1  ;;  %v2726_v37 = vld [vmem:[#allocation10 + $0x64] ss:$8 sps:$4 sm:$0xff]  }
 0x6bc   : > { %v1084_v30 = vpop.f32.mrb[14].mxu1  ;;  %1333 = vmatprep.subr.bf16.mxu1 %v2726_v37  ;;  %v2737_v27 = vld [vmem:[#allocation11 + $0x88] sm:$0xff]   ;;  %v2739_v29 = vld [vmem:[#allocation11 + $0x98] sm:$0xff]   ;;  %v2744_v37 = vld [vmem:[#allocation13] sm:$0xff]  }
 0x6bd   : > { %1088 = vadd.xlane.f32.xlu1 %v1087_v28  ;;  %v2411_v31 = vpop.f32.mrb[15].mxu1  ;;  %v1091_v32 = vmul.f32 %v1087_v28, %v1087_v28  ;;  %1334 = vmatpush1.bf16.msra.mxu1 %v2724_v40  ;;  %v2740_v30 = vld [vmem:[#allocation11 + $0xa0] sm:$0xff]  }
 0x6be   : > { %1335 = vmatprep.subr.bf16.mxu1 %v2730_v43  ;;  %v2741_v31 = vld [vmem:[#allocation11 + $0xa8] sm:$0xff]  }
 0x6c1   : > { %1092 = vadd.xlane.f32.xlu1 %v1091_v32  ;;  %1336 = vmatpush1.bf16.msra.mxu1 %v2728_v42  ;;  %v2742_v32 = vld [vmem:[#allocation11 + $0xb0] sm:$0xff]  }
 0x6c2   : > { %2464 = vmatprep.subr.bf16.mxu1 %v3141_v0 }
 0x6c4   : > { %1354 = vmatmul.mubr.bf16.vlgmr.msra.gmra.mrb[16].mxu1 %v2732_v45 }
 0x6c5   : > { %2480 = vmatprep.mubr.msk.bf16.mxu1 %vm3142_vm0, %v3141_v0  ;;  %2465 = vmatpush3.bf16.msra.mxu1 %v2744_v37 }
 0x6c6   : > { %2466 = vmatprep.subr.bf16.mxu1 %v3141_v0 }
 0x6c9   : > { %2467 = vmatpush3.bf16.msra.mxu1 %v2745_v46  ;;  %v2244_v46 = vld [vmem:[%s3802_s10 + $0x7] ss:$0 sm:$0xff] }
 0x6ca   : > { %2468 = vmatprep.subr.bf16.mxu1 %v3141_v0 }
 0x6cd   : > { %2469 = vmatpush3.bf16.msra.mxu1 %v2746_v47 }
 0x6ce   : > { %2470 = vmatprep.subr.bf16.mxu1 %v3141_v0 }
 0x6d1   : > { %2471 = vmatpush3.bf16.msra.mxu1 %v2747_v48 }
 0x6d2   : > { %2472 = vmatprep.subr.bf16.mxu1 %v3141_v0 }
 0x74a   : > { %v1089_v49 = vpop.xlane.xlu1 %1088 }
 0x74b   : > { %v1090_v50 = vmul.f32 0.03125, %v1089_v49  ;;  %v2748_v49 = vld [vmem:[#allocation13 + $0x20] sm:$0xff]  }
 0x74c   : > { %2473 = vmatpush3.bf16.msra.mxu1 %v2748_v49 }
 0x74d   : > { %v1095_v52 = vmul.f32 %v1090_v50, %v1090_v50  ;;  %v1097_v56 = vsub.f32 %v1087_v28, %v1090_v50  ;;  %v2738_v28 = vld [vmem:[#allocation11 + $0x90] sm:$0xff]   ;;  %v2749_v50 = vld [vmem:[#allocation13 + $0x28] sm:$0xff]   ;;  %2474 = vmatprep.subr.bf16.mxu1 %v3141_v0 }
 0x74e   : > { %v1093_v51 = vpop.xlane.xlu1 %1092 }
 0x74f   : > { %v1094_v53 = vmul.f32 0.03125, %v1093_v51  ;;  %v2750_v51 = vld [vmem:[#allocation13 + $0x30] sm:$0xff]  }
 0x750   : > { %2475 = vmatpush3.bf16.msra.mxu1 %v2749_v50 }
 0x751   : > { %v1096_v54 = vsub.f32 %v1094_v53, %v1095_v52  ;;  %2476 = vmatprep.subr.bf16.mxu1 %v3141_v0  ;;  %v2751_v52 = vld [vmem:[#allocation13 + $0x38] sm:$0xff]   ;;  %v2752_v53 = vld [vmem:[#allocation14] sm:$0xff]  }
 0x753   : > { %v1098_v55 = vadd.f32 1e-05, %v1096_v54  ;;  %v2753_v54 = vld [vmem:[#allocation14 + $0x8] sm:$0xff]  }
 0x754   : > { %2477 = vmatpush3.bf16.msra.mxu1 %v2750_v51  ;;  %v2246_v51 = vld [vmem:[%s3802_s10 + $0x9] ss:$0 sm:$0xff] }
 0x755   : > { %2772 = vrsqrt.f32 %v1098_v55  ;;  %2478 = vmatprep.subr.bf16.mxu1 %v3141_v0  ;;  %v2754_v55 = vld [vmem:[#allocation14 + $0x10] sm:$0xff]  }
 0x758   : > { %2479 = vmatpush3.bf16.msra.mxu1 %v2751_v52 }
 0x759   : > { %2504 = vmatprep.subr.bf16.mxu1 %v3141_v0 }
 0x75f   : > { %v2773_v57 = vpop.eup %2772 }
 0x760   : > { %v1100_v59 = vmul.f32 %v2773_v57, %v1097_v56  ;;  %v2755_v56 = vld [vmem:[#allocation14 + $0x18] sm:$0xff]   ;;  %v2756_v57 = vld [vmem:[#allocation14 + $0x20] sm:$0xff]  }
 0x762   : > { %v1105_v61 = vmul.f32 %v2188_v58, %v1100_v59  ;;  %v2757_v58 = vld [vmem:[#allocation14 + $0x28] sm:$0xff]  }
 0x764   : > { %v3627_v62 = vadd.f32 %v2189_v60, %v1105_v61 }
 0x766   : > { %v1128_v63 = vpack.c.bf16 %v3627_v62, %v3627_v62 }
 0x768   : > { %2429 = vmatmul.mubr.bf16.vlgmr.msra.gmra.mrb[8].mxu0 %v1128_v63 }
 0x769   : > { %2434 = vmatprep.mubr.msk.bf16.mxu0 %vm3142_vm0, %v3141_v0 }
 0x797   : > { %v1355_v1 = vpop.f32.mrb[16].mxu1 }
 0x798   : > { %v1357_v2 = vpop.f32.mrb[17].mxu1 }
 0x799   : > { %v1359_v3 = vpop.f32.mrb[18].mxu1 }
 0x79a   : > { %v1365_v4 = vpack.c.bf16 %v1359_v3, %v1355_v1  ;;  %v1361_v5 = vpop.f32.mrb[19].mxu1 }
 0x79b   : > { %v1419_v6 = vpack.c.bf16 %v1361_v5, %v1357_v2  ;;  %v2224_v5 = vld [vmem:[%s3802_s10 + $0x3] ss:$0 sm:$0xff] }
 0x79c   : > { %2433 = vmatpush3.bf16.xpose.msra.mxu0 %v1365_v4 }
 0x79d   : > { %2438 = vmatprep.subr.bf16.mxu0 %v3141_v0 }
 0x83b   : > { %v1211_v7 = vpop.f32.mrb[8].mxu0 }
 0x83c   : > { %v1364_v8 = vpack.c.bf16 %v1211_v7, %v1211_v7  ;;  %v2430_v9 = vpop.f32.mrb[9].mxu0  ;;  %v2225_v7 = vld [vmem:[%s3802_s10 + $0x4] ss:$0 sm:$0xff] }
 0x83d   : > { %v1214_v10 = vpop.f32.mrb[10].mxu0 }
 0x83e   : > { %v2431_v11 = vpop.f32.mrb[11].mxu0  ;;  %2435 = vmatmul.mubr.bf16.vlgmr.msra.gmra.mrb[12].mxu0 %v1364_v8 }
 0x83f   : > { %2439 = vmatpush3.bf16.msra.mxu0 %v1419_v6  ;;  %2440 = vmatprep.mubr.msk.bf16.mxu0 %vm3142_vm0, %v3141_v0  ;;  %v2758_v11 = vld [vmem:[#allocation14 + $0x30] sm:$0xff]  }
 0x840   : > { %2444 = vmatprep.subr.bf16.mxu0 %v3141_v0 }
 0x911   : > { %v1400_v12 = vpop.f32.mrb[12].mxu0 }
 0x912   : > { %v2436_v13 = vpop.f32.mrb[13].mxu0  ;;  %v1407_v14 = vsel %vm1406_vm3, %v1400_v12, -inf }
 0x913   : > { %1408 = vmax.xlane.f32.xlu0 %v1407_v14  ;;  %v1403_v15 = vpop.f32.mrb[14].mxu0  ;;  %v2226_v13 = vld [vmem:[%s3802_s10 + $0x5] ss:$0 sm:$0xff] }
 0x914   : > { %v2437_v16 = vpop.f32.mrb[15].mxu0 }
 0x9a0   : > { %v1409_v17 = vpop.xlane.xlu0 %1408 }
 0x9a1   : > { %v1410_v18 = vsub.f32 %v1400_v12, %v1409_v17  ;;  %v2759_v12 = vld [vmem:[#allocation14 + $0x38] sm:$0xff]  }
 0x9a3   : > { %v1411_v19 = vmul.f32 1.442695, %v1410_v18 }
 0x9a5   : > { %2774 = vpow2.f32 %v1411_v19 }
 0x9af   : > { %v2775_v20 = vpop.eup %2774 }
 0x9b0   : > { %v1413_v21 = vsel %vm1406_vm3, %v2775_v20, 0.0 }
 0x9b1   : > { %1414 = vadd.xlane.f32.xlu1 %v1413_v21  ;;  %v2760_v21 = vld [vmem:[#allocation16] sm:$0xff]  }
 0xa3e   : > { %v1415_v22 = vpop.xlane.xlu1 %1414 }
 0xa3f   : > { %2776 = vrcp.f32 %v1415_v22  ;;  %v2243_v22 = vld [vmem:[%s3802_s10 + $0x6] ss:$0 sm:$0xff] }
 0xa49   : > { %v2777_v23 = vpop.eup %2776 }
 0xa4a   : > { %v1417_v24 = vmul.f32 %v2777_v23, %v2775_v20 }
 0xa4c   : > { %v1418_v26 = vpack.c.bf16 %v1417_v24, %v1417_v24 }
 0xa4e   : > { %2441 = vmatmul.mubr.msk.bf16.vlgmr.msra.gmra.mrb[16].mxu0 %vm1406_vm3, %v1418_v26 }
 0xa4f   : > { %2445 = vmatpush3.bf16.msra.mxu0 %v2736_v25  ;;  %2460 = vmatprep.mubr.msk.bf16.mxu0 %vm3142_vm0, %v3141_v0 }
 0xa50   : > { %2446 = vmatprep.subr.bf16.mxu0 %v3141_v0 }
 0xa53   : > { %2447 = vmatpush3.bf16.msra.mxu0 %v2737_v27 }
 0xa54   : > { %2448 = vmatprep.subr.bf16.mxu0 %v3141_v0 }
 0xa57   : > { %2449 = vmatpush3.bf16.msra.mxu0 %v2738_v28 }
 0xa58   : > { %2450 = vmatprep.subr.bf16.mxu0 %v3141_v0 }
 0xa5b   : > { %2451 = vmatpush3.bf16.msra.mxu0 %v2739_v29 }
 0xa5c   : > { %2452 = vmatprep.subr.bf16.mxu0 %v3141_v0 }
 0xa5f   : > { %2453 = vmatpush3.bf16.msra.mxu0 %v2740_v30  ;;  %v2761_v30 = vld [vmem:[#allocation16 + $0x8] sm:$0xff]  }
 0xa60   : > { %2454 = vmatprep.subr.bf16.mxu0 %v3141_v0 }
 0xa63   : > { %2455 = vmatpush3.bf16.msra.mxu0 %v2741_v31  ;;  %v2762_v31 = vld [vmem:[#allocation16 + $0x10] sm:$0xff]  }
 0xa64   : > { %2456 = vmatprep.subr.bf16.mxu0 %v3141_v0 }
 0xa67   : > { %2457 = vmatpush3.bf16.msra.mxu0 %v2742_v32  ;;  %v2763_v32 = vld [vmem:[#allocation16 + $0x18] sm:$0xff]  }
 0xa68   : > { %2458 = vmatprep.subr.bf16.mxu0 %v3141_v0 }
 0xa6b   : > { %2459 = vmatpush3.bf16.msra.mxu0 %v2743_v33  ;;  %v2764_v33 = vld [vmem:[#allocation16 + $0x20] sm:$0xff]  }
 0xa6c   : > { %2484 = vmatprep.subr.bf16.mxu0 %v3141_v0 }
 0xb21   : > { %v1457_v34 = vpop.f32.mrb[16].mxu0 }
 0xb22   : > { %v1480_v35 = vpack.c.bf16 %v1457_v34, %v1457_v34  ;;  %v2442_v36 = vpop.f32.mrb[17].mxu0  ;;  %v2765_v34 = vld [vmem:[#allocation16 + $0x28] sm:$0xff]  }
 0xb23   : > { %v1460_v38 = vpop.f32.mrb[18].mxu0  ;;  %v2767_v36 = vld [vmem:[#allocation16 + $0x38] sm:$0xff]  }
 0xb24   : > { %v2443_v39 = vpop.f32.mrb[19].mxu0  ;;  %2461 = vmatmul.mubr.bf16.vlgmr.msra.gmra.mrb[20].mxu0 %v1480_v35  ;;  %v2766_v35 = vld [vmem:[#allocation16 + $0x30] sm:$0xff]  }
 0xb25   : > { %2500 = vmatprep.mubr.msk.bf16.mxu0 %vm3142_vm0, %v3141_v0  ;;  %2485 = vmatpush3.bf16.msra.mxu0 %v2752_v53 }
 0xb26   : > { %2486 = vmatprep.subr.bf16.mxu0 %v3141_v0 }
 0xb29   : > { %2487 = vmatpush3.bf16.msra.mxu0 %v2753_v54 }
 0xb2a   : > { %2488 = vmatprep.subr.bf16.mxu0 %v3141_v0 }
 0xb2d   : > { %2489 = vmatpush3.bf16.msra.mxu0 %v2754_v55 }
 0xb2e   : > { %2490 = vmatprep.subr.bf16.mxu0 %v3141_v0 }
 0xb31   : > { %2491 = vmatpush3.bf16.msra.mxu0 %v2755_v56 }
 0xb32   : > { %2492 = vmatprep.subr.bf16.mxu0 %v3141_v0 }
 0xb35   : > { %2493 = vmatpush3.bf16.msra.mxu0 %v2756_v57 }
 0xb36   : > { %2494 = vmatprep.subr.bf16.mxu0 %v3141_v0 }
 0xb39   : > { %2495 = vmatpush3.bf16.msra.mxu0 %v2757_v58 }
 0xb3a   : > { %2496 = vmatprep.subr.bf16.mxu0 %v3141_v0 }
 0xb3d   : > { %2497 = vmatpush3.bf16.msra.mxu0 %v2758_v11 }
 0xb3e   : > { %2498 = vmatprep.subr.bf16.mxu0 %v3141_v0 }
 0xb41   : > { %2499 = vmatpush3.bf16.msra.mxu0 %v2759_v12 }
 0xbf7   : > { %v1563_v40 = vpop.f32.mrb[20].mxu0 }
 0xbf8   : > { %v1569_v41 = vadd.f32 %v1563_v40, %v3627_v62  ;;  %v2462_v42 = vpop.f32.mrb[21].mxu0 }
 0xbf9   : > { %v1566_v43 = vpop.f32.mrb[22].mxu0 }
 0xbfa   : > { %1570 = vadd.xlane.f32.xlu0 %v1569_v41  ;;  %v2463_v44 = vpop.f32.mrb[23].mxu0  ;;  %v1573_v45 = vmul.f32 %v1569_v41, %v1569_v41 }
 0xbfc   : > { %1574 = vadd.xlane.f32.xlu1 %v1573_v45 }
 0xc87   : > { %v1571_v59 = vpop.xlane.xlu0 %1570 }
 0xc88   : > { %v1572_v60 = vmul.f32 0.03125, %v1571_v59 }
 0xc89   : > { %v1575_v61 = vpop.xlane.xlu1 %1574 }
 0xc8a   : > { %v1577_v62 = vmul.f32 %v1572_v60, %v1572_v60  ;;  %v1576_v63 = vmul.f32 0.03125, %v1575_v61  ;;  %v1579_v3 = vsub.f32 %v1569_v41, %v1572_v60 }
 0xc8c   : > { %v1578_v1 = vsub.f32 %v1576_v63, %v1577_v62 }
 0xc8e   : > { %v1580_v2 = vadd.f32 1e-05, %v1578_v1 }
 0xc90   : > { %2778 = vrsqrt.f32 %v1580_v2 }
 0xc9a   : > { %v2779_v4 = vpop.eup %2778 }
 0xc9b   : > { %v1582_v6 = vmul.f32 %v2779_v4, %v1579_v3 }
 0xc9d   : > { %v1587_v8 = vmul.f32 %v2224_v5, %v1582_v6 }
 0xc9f   : > { %v1592_v9 = vadd.f32 %v2225_v7, %v1587_v8 }
 0xca1   : > { %v1609_v10 = vpack.c.bf16 %v1592_v9, %v1592_v9 }
 0xca3   : > { %2481 = vmatmul.mubr.bf16.vlgmr.msra.gmra.mrb[20].mxu1 %v1609_v10 }
 0xca4   : > { %2520 = vmatprep.mubr.msk.bf16.mxu1 %vm3142_vm0, %v3141_v0  ;;  %2505 = vmatpush3.bf16.msra.mxu1 %v2760_v21 }
 0xca5   : > { %2506 = vmatprep.subr.bf16.mxu1 %v3141_v0 }
 0xca8   : > { %2507 = vmatpush3.bf16.msra.mxu1 %v2761_v30 }
 0xca9   : > { %2508 = vmatprep.subr.bf16.mxu1 %v3141_v0 }
 0xcac   : > { %2509 = vmatpush3.bf16.msra.mxu1 %v2762_v31 }
 0xcad   : > { %2510 = vmatprep.subr.bf16.mxu1 %v3141_v0 }
 0xcb0   : > { %2511 = vmatpush3.bf16.msra.mxu1 %v2763_v32 }
 0xcb1   : > { %2512 = vmatprep.subr.bf16.mxu1 %v3141_v0 }
 0xcb4   : > { %2513 = vmatpush3.bf16.msra.mxu1 %v2764_v33 }
 0xcb5   : > { %2514 = vmatprep.subr.bf16.mxu1 %v3141_v0 }
 0xcb8   : > { %2515 = vmatpush3.bf16.msra.mxu1 %v2765_v34 }
 0xcb9   : > { %2516 = vmatprep.subr.bf16.mxu1 %v3141_v0 }
 0xcbc   : > { %2517 = vmatpush3.bf16.msra.mxu1 %v2766_v35 }
 0xcbd   : > { %2518 = vmatprep.subr.bf16.mxu1 %v3141_v0  ;;  %v2245_v0 = vld [vmem:[%s3802_s10 + $0x8] ss:$0 sm:$0xff] }
 0xcc0   : > { %2519 = vmatpush3.bf16.msra.mxu1 %v2767_v36 }
 0xd76   : > { %v1696_v14 = vpop.f32.mrb[20].mxu1 }
 0xd77   : > { %v1697_v15 = vadd.f32 %v2226_v13, %v1696_v14  ;;  %v2482_v16 = vpop.f32.mrb[21].mxu1 }
 0xd78   : > { %v1699_v17 = vpop.f32.mrb[22].mxu1 }
 0xd79   : > { %v1702_v18 = vmax.f32 %v1697_v15, 0.0  ;;  %v2483_v19 = vpop.f32.mrb[23].mxu1 }
 0xd7b   : > { %v1719_v20 = vpack.c.bf16 %v1702_v18, %v1702_v18 }
 0xd7d   : > { %2501 = vmatmul.mubr.bf16.vlgmr.msra.gmra.mrb[24].mxu0 %v1719_v20 }
 0xe50   : > { %v1802_v23 = vpop.f32.mrb[24].mxu0 }
 0xe51   : > { %v1808_v24 = vadd.f32 %v1802_v23, %v1592_v9  ;;  %v2502_v25 = vpop.f32.mrb[25].mxu0 }
 0xe52   : > { %v1805_v26 = vpop.f32.mrb[26].mxu0 }
 0xe53   : > { %v1813_v27 = vadd.f32 %v2243_v22, %v1808_v24  ;;  %v2503_v28 = vpop.f32.mrb[27].mxu0 }
 0xe55   : > { %1814 = vadd.xlane.f32.xlu0 %v1813_v27  ;;  %v1817_v29 = vmul.f32 %v1813_v27, %v1813_v27 }
 0xe57   : > { %1818 = vadd.xlane.f32.xlu1 %v1817_v29 }
 0xee2   : > { %v1815_v38 = vpop.xlane.xlu0 %1814 }
 0xee3   : > { %v1816_v39 = vmul.f32 0.03125, %v1815_v38 }
 0xee4   : > { %v1819_v37 = vpop.xlane.xlu1 %1818 }
 0xee5   : > { %v1821_v40 = vmul.f32 %v1816_v39, %v1816_v39  ;;  %v1820_v41 = vmul.f32 0.03125, %v1819_v37  ;;  %v1823_v44 = vsub.f32 %v1813_v27, %v1816_v39 }
 0xee7   : > { %v1822_v42 = vsub.f32 %v1820_v41, %v1821_v40 }
 0xee9   : > { %v1824_v43 = vadd.f32 1e-05, %v1822_v42 }
 0xeeb   : > { %2780 = vrsqrt.f32 %v1824_v43 }
 0xef5   : > { %v2781_v45 = vpop.eup %2780 }
 0xef6   : > { %v1826_v47 = vmul.f32 %v2781_v45, %v1823_v44 }
 0xef8   : > { %v1831_v48 = vmul.f32 %v2244_v46, %v1826_v47 }
 0xefa   : > { %v1836_v49 = vadd.f32 %v2245_v0, %v1831_v48 }
 0xefc   : > { %v1853_v50 = vpack.c.bf16 %v1836_v49, %v1836_v49 }
 0xefe   : > { %2521 = vmatmul.mubr.bf16.vlgmr.msra.gmra.mrb[24].mxu1 %v1853_v50 }
 0xfd1   : > { %v1940_v52 = vpop.f32.mrb[24].mxu1 }
 0xfd2   : > { %v1941_v53 = vadd.f32 %v2246_v51, %v1940_v52  ;;  %v2522_v54 = vpop.f32.mrb[25].mxu1 }
 0xfd3   : > { %v1943_v55 = vpop.f32.mrb[26].mxu1 }
 0xfd4   : > { %1946 = vst [vmem:[%s515_s30] sm:$0xff] %v1941_v53  ;;  %v2523_v56 = vpop.f32.mrb[27].mxu1 }
 0xfd5   : > { %3051 = shalt.err (!%p3048_p3)
}
 0xfd6   : > { %s3052_s6 = scalar_lea.hbm %s3704_s12, 128  ;;  %s3056_s26 = scalar_lea.hbm %s3803_s23, 256 }
 0xfd7   : > { %p3053_p10 = scmp.ne.s32.totalorder %s3704_s12, %s3052_s6  ;;  %p3057_p12 = scmp.lt.u32.totalorder %s3704_s12, %s3803_s23 }
 0xfd8   : > { %p3058_p2 = scmp.lt.u32.totalorder %s3056_s26, %s3052_s6  ;;  %p3060_p6 = scmp.lt.u32.totalorder %s3052_s6, %s3704_s12 }
 0xfd9   : > { %p3054_p1 = pnand %p3053_p10, %p3804_p9 }
 0xfda   : > { %p3059_p13 = por %p3058_p2, %p3057_p12 }
 0xfdb   : > { %p3055_p11 = pneg %p3054_p1 }
 0xfdc   : > { %p3061_p0 = por %p3060_p6, %p3059_p13 }
 0xfde   : > { %p3062_p5 = pnand %p3061_p0, %p3055_p11 }
 0xfe0   : > { %3065 = shalt.err (!%p3062_p5)
}
 0xfe1   : > { %2556 = dma.vmem_to_hbm [thread:$0]  (%p3804_p9), %s3706_s9, 128, %s3704_s12, %s1948_s19  }
 0xfe2 PF: > { %s1973_s29 = sand.u32 1, %s3112_s13   ;;  %p3805_p7 = scmp.ne.s32.totalorder %s3789_s25, 0 }
 0xfe3   : > { %p3806_p8 = scmp.ge.s32.totalorder %s3124_s16, 2  ;;  %s1974_s24 = scalar_lea.sflag [#allocation4], %s1973_s29 }
 0xfe5   : > { %p2588_p4 = pnand %p3806_p8, %p3805_p7 }
 0xfe7   : > { %3107 = dma.done.wait (!%p2588_p4), %s1974_s24, 128  }
 0xfe8   : > { %3109 = vsyncadd (!%p2588_p4), %s1974_s24, 4294967168  ;;  %p29_p3 = scmp.ge.s32.totalorder %s3405_s11, 4   ;;  %s3807_s13 = smov %s3116_s14 }
 0xfe9   : > { %s3808_s14 = smov %s3120_s15  ;;  %s3809_s15 = smov %s3417_s3 }
 0xfea   : > { %s3810_s16 = smov %s3405_s11  ;;  %31 = sbr.rel (!%p29_p3) target bundleno = 19 (0x13), region = 148 }
 0xff1   :  { %1979 = vsyncpa [#allocation3], 1 }
 0xff2   :  { %1981 = vsyncpa [#allocation3 + $0x1], 1 }
 0xff3   :  { %1982 = vsyncpa [#allocation6], 1 }
 0xff4   :  { %1984 = vsyncpa [#allocation6 + $0x1], 1 }
 0xff5   :  { %1985 = vsyncpa [#allocation9], 1 }
 0xff6   :  { %1986 = vsyncpa [#allocation12], 1 }
 0xff7   :  { %1987 = vsyncpa [#allocation15], 1 }
 0xff8   :  { %1988 = vsyncpa [#allocation4], 1 }
 0xff9   :  { %1990 = vsyncpa [#allocation4 + $0x1], 1 }

</bundles_post_ra>
